<compile_context>
chip_gen: v5e
topology: v5e:2x2
jax: 0.10.0
libtpu: 0.0.40
codegen_flags: <defaults>
</compile_context>

<pallas_src>
import functools

import jax
import jax.numpy as jnp
import numpy as np
from jax.experimental import pallas as pl
from jax.experimental.pallas import tpu as pltpu


def _conv3d_im2col_tile_kernel(xa_ref, xb_ref, w_ref, m_ref,
                               conv_ref, sum_ref, m2_ref, slab_ref,
                               *, cin, hp, wp, tq):
    """One (batch, Q-tile) grid step.

    xa_ref  : (Cin, TQ)      bf16  input flat tile  [q*TQ, (q+1)*TQ)
    xb_ref  : (Cin, TQ)      bf16  halo tile        [(q+1)*TQ, (q+2)*TQ)
    w_ref   : (Cout, 27*Cin) bf16  column = ((kd*3+kh)*3+kw)*Cin + ci
    m_ref   : (1, TQ)        f32   1.0 where the flat position is a valid output
    conv_ref: (Cout, TQ)     bf16  conv output tile (lane-dense store)
    sum_ref : (Cout, 1)      f32   masked sum over this tile
    m2_ref  : (Cout, 1)      f32   masked, tile-mean-centered sum of squares
    slab_ref: (27*Cin, TQ)   f32   VMEM im2col scratch
    """
    # Tile + halo concatenated so every tap offset (< TQ) is a static slice.
    xcat = jnp.concatenate([xa_ref[...], xb_ref[...]],
                           axis=-1).astype(jnp.float32)          # (Cin, 2*TQ)

    t = 0
    for kd in range(3):
        for kh in range(3):
            for kw in range(3):
                off = (kd * hp + kh) * wp + kw                   # static, < TQ
                slab_ref[pl.ds(t * cin, cin), :] = xcat[:, off:off + tq]
                t += 1

    w = w_ref[...].astype(jnp.float32)                           # (Cout, 27*Cin)
    conv = jnp.dot(w, slab_ref[...],
                   preferred_element_type=jnp.float32)           # (Cout, TQ) f32
    conv_ref[...] = conv.astype(conv_ref.dtype)                  # no mask on store

    # Partial BN statistics: masked and centered at the tile mean so the
    # cross-tile merge (Chan) avoids E[y^2] - mean^2 cancellation.
    msk = m_ref[...]                                             # (1, TQ)
    cnt = jnp.sum(msk)
    s = jnp.sum(conv * msk, axis=1, keepdims=True)               # (Cout, 1)
    mu = s * (1.0 / jnp.maximum(cnt, 1.0))
    d = (conv - mu) * msk
    sum_ref[...] = s
    m2_ref[...] = jnp.sum(d * d, axis=1, keepdims=True)


def conv_bn_relu_3d(x, weight, gamma, beta, *, eps=1e-5, slope=0.01, tile_q=1024):
    """x: (B, Cin, D, H, W) f32; weight: (Cout, Cin, 3, 3, 3) -> (B, Cout, D, H, W)."""
    B, Cin, D, H, W = x.shape
    Cout, Cin_w, K0, K1, K2 = weight.shape
    assert (Cin_w, K0, K1, K2) == (Cin, 3, 3, 3)

    Dp, Hp, Wp = D + 2, H + 2, W + 2
    Sb = Dp * Hp * Wp                                    # per-batch padded flat length
    pmax = ((D - 1) * Hp + (H - 1)) * Wp + (W - 1)       # last valid flat output index
    max_off = (2 * Hp + 2) * Wp + 2                      # largest conv tap offset
    LANE = 128
    TQ = max(tile_q, ((max_off + LANE - 1) // LANE) * LANE)
    assert TQ >= max_off                                 # halo fits in one extra tile
    n_qt = -(-(pmax + 1) // TQ)                          # Q tiles per batch
    Sq = n_qt * TQ                                       # flat positions computed
    Sx = (n_qt + 1) * TQ                                 # input length incl. halo tile

    # --- staging: spatial pad + per-batch flatten (no transpose) + bf16 cast ---
    xpad = jnp.pad(x, ((0, 0), (0, 0), (1, 1), (1, 1), (1, 1)))
    x2 = xpad.reshape(B, Cin, Sb)
    x2 = jnp.pad(x2, ((0, 0), (0, 0), (0, Sx - Sb))).astype(jnp.bfloat16)

    # weights -> (Cout, 27*Cin), column = tap*Cin + ci
    w2 = weight.transpose(0, 2, 3, 4, 1).reshape(Cout, 27 * Cin).astype(jnp.bfloat16)

    # Validity mask over flat positions (same for every batch; fully static).
    mnp = np.zeros((Dp, Hp, Wp), np.float32)
    mnp[:D, :H, :W] = 1.0
    mflat = np.pad(mnp.reshape(Sb), (0, max(0, Sq - Sb)))[:Sq]
    mask = jnp.asarray(mflat.reshape(1, Sq))
    counts = mflat.reshape(n_qt, TQ).sum(axis=1)         # static per-tile valid counts

    kernel = functools.partial(_conv3d_im2col_tile_kernel,
                               cin=Cin, hp=Hp, wp=Wp, tq=TQ)

    conv_flat, sums, m2s = pl.pallas_call(
        kernel,
        out_shape=(
            jax.ShapeDtypeStruct((B, Cout, Sq), jnp.bfloat16),
            jax.ShapeDtypeStruct((B * n_qt, Cout, 1), jnp.float32),
            jax.ShapeDtypeStruct((B * n_qt, Cout, 1), jnp.float32),
        ),
        grid=(B, n_qt),
        in_specs=[
            pl.BlockSpec((None, Cin, TQ), lambda b, q: (b, 0, q)),       # tile
            pl.BlockSpec((None, Cin, TQ), lambda b, q: (b, 0, q + 1)),   # halo tile
            pl.BlockSpec((Cout, 27 * Cin), lambda b, q: (0, 0)),         # weights
            pl.BlockSpec((1, TQ), lambda b, q: (0, q)),                  # mask
        ],
        out_specs=(
            pl.BlockSpec((None, Cout, TQ), lambda b, q: (b, 0, q)),
            pl.BlockSpec((None, Cout, 1), lambda b, q: (b * n_qt + q, 0, 0)),
            pl.BlockSpec((None, Cout, 1), lambda b, q: (b * n_qt + q, 0, 0)),
        ),
        scratch_shapes=[pltpu.VMEM((27 * Cin, TQ), jnp.float32)],
        compiler_params=pltpu.CompilerParams(
            dimension_semantics=("parallel", "parallel"),   # both TCs on v7x
            vmem_limit_bytes=32 * 1024 * 1024),
    )(x2, x2, w2, mask)

    # --- tiny cross-tile stats merge (Chan / parallel variance), all f32 ---
    n = float(B * D * H * W)
    s_t = sums.reshape(B, n_qt, Cout)
    m2_t = m2s.reshape(B, n_qt, Cout)
    n_t = jnp.asarray(counts, jnp.float32).reshape(1, n_qt, 1)
    mean = jnp.sum(s_t, axis=(0, 1)) / n                                   # (Cout,)
    mu_t = s_t / jnp.maximum(n_t, 1.0)
    var = (jnp.sum(m2_t, axis=(0, 1))
           + jnp.sum(n_t * (mu_t - mean) ** 2, axis=(0, 1))) / n           # biased
    scale = gamma.astype(jnp.float32) * jax.lax.rsqrt(var + eps)
    shift = beta.astype(jnp.float32) - mean * scale

    # --- fused XLA epilogue: un-flatten + affine + LeakyReLU (one HBM pass) ---
    if Sq >= Sb:
        flat = conv_flat[:, :, :Sb]
    else:
        flat = jnp.pad(conv_flat, ((0, 0), (0, 0), (0, Sb - Sq)))
    y = flat.reshape(B, Cout, Dp, Hp, Wp)[:, :, :D, :H, :W].astype(jnp.float32)
    y = y * scale.reshape(1, Cout, 1, 1, 1) + shift.reshape(1, Cout, 1, 1, 1)
    return jnp.where(y > 0, y, slope * y)


if __name__ == "__main__":
    key = jax.random.PRNGKey(0)
    k_x, k_w = jax.random.split(key)

    B, Cin, Cout, D, H, W = 2, 4, 8, 8, 16, 16
    x = jax.random.normal(k_x, (B, Cin, D, H, W), jnp.float32)

    fan_in = Cin * 27
    bound = 1.0 / (fan_in ** 0.5)
    weight = jax.random.uniform(k_w, (Cout, Cin, 3, 3, 3), jnp.float32, -bound, bound)
    gamma = jnp.ones((Cout,), jnp.float32)       # InPlaceABN affine init
    beta = jnp.zeros((Cout,), jnp.float32)

    out = jax.jit(conv_bn_relu_3d)(x, weight, gamma, beta)
    out = jax.block_until_ready(out)
    assert out.shape == (B, Cout, D, H, W), out.shape

    # Reference: XLA Conv3d + training-mode BatchNorm (biased var) + LeakyReLU(0.01)
    conv = jax.lax.conv_general_dilated(
        x, weight, window_strides=(1, 1, 1), padding=((1, 1), (1, 1), (1, 1)),
        dimension_numbers=("NCDHW", "OIDHW", "NCDHW"),
        precision=jax.lax.Precision.HIGHEST)
    mu = conv.mean(axis=(0, 2, 3, 4), keepdims=True)
    var = ((conv - mu) ** 2).mean(axis=(0, 2, 3, 4), keepdims=True)
    ref = (conv - mu) * jax.lax.rsqrt(var + 1e-5)
    ref = ref * gamma.reshape(1, -1, 1, 1, 1) + beta.reshape(1, -1, 1, 1, 1)
    ref = jnp.where(ref > 0, ref, 0.01 * ref)
    err = float(jnp.max(jnp.abs(out - ref)))
    assert err < 1e-1, f"max abs error vs reference: {err}"

    print("KERNEL_OK")
</pallas_src>

<mosaic_0001>
module attributes {stable_mosaic.version = 11 : i64} {
  func.func @_conv3d_im2col_tile_kernel(%arg0: i32, %arg1: i32, %arg2: memref<1x4x1024xbf16, #tpu.memory_space<vmem>>, %arg3: memref<1x4x1024xbf16, #tpu.memory_space<vmem>>, %arg4: memref<8x108xbf16, #tpu.memory_space<vmem>>, %arg5: memref<1x1024xf32, #tpu.memory_space<vmem>>, %arg6: memref<1x8x1024xbf16, #tpu.memory_space<vmem>>, %arg7: memref<1x8x1xf32, #tpu.memory_space<vmem>>, %arg8: memref<1x8x1xf32, #tpu.memory_space<vmem>>, %arg9: memref<108x1024xf32, #tpu.memory_space<vmem>>) attributes {dimension_semantics = [#tpu.dimension_semantics<parallel>, #tpu.dimension_semantics<parallel>], iteration_bounds = array<i64: 2, 3>, scalar_prefetch = 0 : i64, scratch_operands = 1 : i64, tpu.core_type = #tpu.core_type<tc>, window_params = [{transform_indices = @transform_0, window_bounds = array<i64: 1, 4, 1024>}, {transform_indices = @transform_1, window_bounds = array<i64: 1, 4, 1024>}, {pipeline_mode = #tpu.pipeline_mode<synchronous>, transform_indices = @transform_2, window_bounds = array<i64: 8, 108>}, {transform_indices = @transform_3, window_bounds = array<i64: 1, 1024>}, {transform_indices = @transform_4, window_bounds = array<i64: 1, 8, 1024>}, {transform_indices = @transform_5, window_bounds = array<i64: 1, 8, 1>}, {transform_indices = @transform_6, window_bounds = array<i64: 1, 8, 1>}]} {
    %c0 = arith.constant 0 : index
    %c0_0 = arith.constant 0 : index
    %c0_1 = arith.constant 0 : index
    %0 = vector.load %arg2[%c0, %c0_0, %c0_1] : memref<1x4x1024xbf16, #tpu.memory_space<vmem>>, vector<1x4x1024xbf16>
    %1 = vector.shape_cast %0 : vector<1x4x1024xbf16> to vector<4x1024xbf16>
    %c0_2 = arith.constant 0 : index
    %c0_3 = arith.constant 0 : index
    %c0_4 = arith.constant 0 : index
    %2 = vector.load %arg3[%c0_2, %c0_3, %c0_4] : memref<1x4x1024xbf16, #tpu.memory_space<vmem>>, vector<1x4x1024xbf16>
    %3 = vector.shape_cast %2 : vector<1x4x1024xbf16> to vector<4x1024xbf16>
    %4 = tpu.concatenate %1, %3 in 1 : vector<4x1024xbf16>, vector<4x1024xbf16> -> vector<4x2048xbf16>
    %5 = arith.extf %4 : vector<4x2048xbf16> to vector<4x2048xf32>
    %6 = vector.extract_strided_slice %5 {offsets = [0, 0], sizes = [4, 1024], strides = [1, 1]} : vector<4x2048xf32> to vector<4x1024xf32>
    %c0_5 = arith.constant 0 : index
    %c0_6 = arith.constant 0 : index
    %7 = vector.load %arg9[%c0_5, %c0_6] : memref<108x1024xf32, #tpu.memory_space<vmem>>, vector<4x1024xf32>
    tpu.vector_store %arg9[%c0_5, %c0_6], %6 {strides = array<i32>} : memref<108x1024xf32, #tpu.memory_space<vmem>>, vector<4x1024xf32>,
    %8 = vector.extract_strided_slice %5 {offsets = [0, 1], sizes = [4, 1024], strides = [1, 1]} : vector<4x2048xf32> to vector<4x1024xf32>
    %c4 = arith.constant 4 : index
    %c0_7 = arith.constant 0 : index
    %9 = vector.load %arg9[%c4, %c0_7] : memref<108x1024xf32, #tpu.memory_space<vmem>>, vector<4x1024xf32>
    tpu.vector_store %arg9[%c4, %c0_7], %8 {strides = array<i32>} : memref<108x1024xf32, #tpu.memory_space<vmem>>, vector<4x1024xf32>,
    %10 = vector.extract_strided_slice %5 {offsets = [0, 2], sizes = [4, 1024], strides = [1, 1]} : vector<4x2048xf32> to vector<4x1024xf32>
    %c8 = arith.constant 8 : index
    %c0_8 = arith.constant 0 : index
    %11 = vector.load %arg9[%c8, %c0_8] : memref<108x1024xf32, #tpu.memory_space<vmem>>, vector<4x1024xf32>
    tpu.vector_store %arg9[%c8, %c0_8], %10 {strides = array<i32>} : memref<108x1024xf32, #tpu.memory_space<vmem>>, vector<4x1024xf32>,
    %12 = vector.extract_strided_slice %5 {offsets = [0, 18], sizes = [4, 1024], strides = [1, 1]} : vector<4x2048xf32> to vector<4x1024xf32>
    %c12 = arith.constant 12 : index
    %c0_9 = arith.constant 0 : index
    %13 = vector.load %arg9[%c12, %c0_9] : memref<108x1024xf32, #tpu.memory_space<vmem>>, vector<4x1024xf32>
    tpu.vector_store %arg9[%c12, %c0_9], %12 {strides = array<i32>} : memref<108x1024xf32, #tpu.memory_space<vmem>>, vector<4x1024xf32>,
    %14 = vector.extract_strided_slice %5 {offsets = [0, 19], sizes = [4, 1024], strides = [1, 1]} : vector<4x2048xf32> to vector<4x1024xf32>
    %c16 = arith.constant 16 : index
    %c0_10 = arith.constant 0 : index
    %15 = vector.load %arg9[%c16, %c0_10] : memref<108x1024xf32, #tpu.memory_space<vmem>>, vector<4x1024xf32>
    tpu.vector_store %arg9[%c16, %c0_10], %14 {strides = array<i32>} : memref<108x1024xf32, #tpu.memory_space<vmem>>, vector<4x1024xf32>,
    %16 = vector.extract_strided_slice %5 {offsets = [0, 20], sizes = [4, 1024], strides = [1, 1]} : vector<4x2048xf32> to vector<4x1024xf32>
    %c20 = arith.constant 20 : index
    %c0_11 = arith.constant 0 : index
    %17 = vector.load %arg9[%c20, %c0_11] : memref<108x1024xf32, #tpu.memory_space<vmem>>, vector<4x1024xf32>
    tpu.vector_store %arg9[%c20, %c0_11], %16 {strides = array<i32>} : memref<108x1024xf32, #tpu.memory_space<vmem>>, vector<4x1024xf32>,
    %18 = vector.extract_strided_slice %5 {offsets = [0, 36], sizes = [4, 1024], strides = [1, 1]} : vector<4x2048xf32> to vector<4x1024xf32>
    %c24 = arith.constant 24 : index
    %c0_12 = arith.constant 0 : index
    %19 = vector.load %arg9[%c24, %c0_12] : memref<108x1024xf32, #tpu.memory_space<vmem>>, vector<4x1024xf32>
    tpu.vector_store %arg9[%c24, %c0_12], %18 {strides = array<i32>} : memref<108x1024xf32, #tpu.memory_space<vmem>>, vector<4x1024xf32>,
    %20 = vector.extract_strided_slice %5 {offsets = [0, 37], sizes = [4, 1024], strides = [1, 1]} : vector<4x2048xf32> to vector<4x1024xf32>
    %c28 = arith.constant 28 : index
    %c0_13 = arith.constant 0 : index
    %21 = vector.load %arg9[%c28, %c0_13] : memref<108x1024xf32, #tpu.memory_space<vmem>>, vector<4x1024xf32>
    tpu.vector_store %arg9[%c28, %c0_13], %20 {strides = array<i32>} : memref<108x1024xf32, #tpu.memory_space<vmem>>, vector<4x1024xf32>,
    %22 = vector.extract_strided_slice %5 {offsets = [0, 38], sizes = [4, 1024], strides = [1, 1]} : vector<4x2048xf32> to vector<4x1024xf32>
    %c32 = arith.constant 32 : index
    %c0_14 = arith.constant 0 : index
    %23 = vector.load %arg9[%c32, %c0_14] : memref<108x1024xf32, #tpu.memory_space<vmem>>, vector<4x1024xf32>
    tpu.vector_store %arg9[%c32, %c0_14], %22 {strides = array<i32>} : memref<108x1024xf32, #tpu.memory_space<vmem>>, vector<4x1024xf32>,
    %24 = vector.extract_strided_slice %5 {offsets = [0, 324], sizes = [4, 1024], strides = [1, 1]} : vector<4x2048xf32> to vector<4x1024xf32>
    %c36 = arith.constant 36 : index
    %c0_15 = arith.constant 0 : index
    %25 = vector.load %arg9[%c36, %c0_15] : memref<108x1024xf32, #tpu.memory_space<vmem>>, vector<4x1024xf32>
    tpu.vector_store %arg9[%c36, %c0_15], %24 {strides = array<i32>} : memref<108x1024xf32, #tpu.memory_space<vmem>>, vector<4x1024xf32>,
    %26 = vector.extract_strided_slice %5 {offsets = [0, 325], sizes = [4, 1024], strides = [1, 1]} : vector<4x2048xf32> to vector<4x1024xf32>
    %c40 = arith.constant 40 : index
    %c0_16 = arith.constant 0 : index
    %27 = vector.load %arg9[%c40, %c0_16] : memref<108x1024xf32, #tpu.memory_space<vmem>>, vector<4x1024xf32>
    tpu.vector_store %arg9[%c40, %c0_16], %26 {strides = array<i32>} : memref<108x1024xf32, #tpu.memory_space<vmem>>, vector<4x1024xf32>,
    %28 = vector.extract_strided_slice %5 {offsets = [0, 326], sizes = [4, 1024], strides = [1, 1]} : vector<4x2048xf32> to vector<4x1024xf32>
    %c44 = arith.constant 44 : index
    %c0_17 = arith.constant 0 : index
    %29 = vector.load %arg9[%c44, %c0_17] : memref<108x1024xf32, #tpu.memory_space<vmem>>, vector<4x1024xf32>
    tpu.vector_store %arg9[%c44, %c0_17], %28 {strides = array<i32>} : memref<108x1024xf32, #tpu.memory_space<vmem>>, vector<4x1024xf32>,
    %30 = vector.extract_strided_slice %5 {offsets = [0, 342], sizes = [4, 1024], strides = [1, 1]} : vector<4x2048xf32> to vector<4x1024xf32>
    %c48 = arith.constant 48 : index
    %c0_18 = arith.constant 0 : index
    %31 = vector.load %arg9[%c48, %c0_18] : memref<108x1024xf32, #tpu.memory_space<vmem>>, vector<4x1024xf32>
    tpu.vector_store %arg9[%c48, %c0_18], %30 {strides = array<i32>} : memref<108x1024xf32, #tpu.memory_space<vmem>>, vector<4x1024xf32>,
    %32 = vector.extract_strided_slice %5 {offsets = [0, 343], sizes = [4, 1024], strides = [1, 1]} : vector<4x2048xf32> to vector<4x1024xf32>
    %c52 = arith.constant 52 : index
    %c0_19 = arith.constant 0 : index
    %33 = vector.load %arg9[%c52, %c0_19] : memref<108x1024xf32, #tpu.memory_space<vmem>>, vector<4x1024xf32>
    tpu.vector_store %arg9[%c52, %c0_19], %32 {strides = array<i32>} : memref<108x1024xf32, #tpu.memory_space<vmem>>, vector<4x1024xf32>,
    %34 = vector.extract_strided_slice %5 {offsets = [0, 344], sizes = [4, 1024], strides = [1, 1]} : vector<4x2048xf32> to vector<4x1024xf32>
    %c56 = arith.constant 56 : index
    %c0_20 = arith.constant 0 : index
    %35 = vector.load %arg9[%c56, %c0_20] : memref<108x1024xf32, #tpu.memory_space<vmem>>, vector<4x1024xf32>
    tpu.vector_store %arg9[%c56, %c0_20], %34 {strides = array<i32>} : memref<108x1024xf32, #tpu.memory_space<vmem>>, vector<4x1024xf32>,
    %36 = vector.extract_strided_slice %5 {offsets = [0, 360], sizes = [4, 1024], strides = [1, 1]} : vector<4x2048xf32> to vector<4x1024xf32>
    %c60 = arith.constant 60 : index
    %c0_21 = arith.constant 0 : index
    %37 = vector.load %arg9[%c60, %c0_21] : memref<108x1024xf32, #tpu.memory_space<vmem>>, vector<4x1024xf32>
    tpu.vector_store %arg9[%c60, %c0_21], %36 {strides = array<i32>} : memref<108x1024xf32, #tpu.memory_space<vmem>>, vector<4x1024xf32>,
    %38 = vector.extract_strided_slice %5 {offsets = [0, 361], sizes = [4, 1024], strides = [1, 1]} : vector<4x2048xf32> to vector<4x1024xf32>
    %c64 = arith.constant 64 : index
    %c0_22 = arith.constant 0 : index
    %39 = vector.load %arg9[%c64, %c0_22] : memref<108x1024xf32, #tpu.memory_space<vmem>>, vector<4x1024xf32>
    tpu.vector_store %arg9[%c64, %c0_22], %38 {strides = array<i32>} : memref<108x1024xf32, #tpu.memory_space<vmem>>, vector<4x1024xf32>,
    %40 = vector.extract_strided_slice %5 {offsets = [0, 362], sizes = [4, 1024], strides = [1, 1]} : vector<4x2048xf32> to vector<4x1024xf32>
    %c68 = arith.constant 68 : index
    %c0_23 = arith.constant 0 : index
    %41 = vector.load %arg9[%c68, %c0_23] : memref<108x1024xf32, #tpu.memory_space<vmem>>, vector<4x1024xf32>
    tpu.vector_store %arg9[%c68, %c0_23], %40 {strides = array<i32>} : memref<108x1024xf32, #tpu.memory_space<vmem>>, vector<4x1024xf32>,
    %42 = vector.extract_strided_slice %5 {offsets = [0, 648], sizes = [4, 1024], strides = [1, 1]} : vector<4x2048xf32> to vector<4x1024xf32>
    %c72 = arith.constant 72 : index
    %c0_24 = arith.constant 0 : index
    %43 = vector.load %arg9[%c72, %c0_24] : memref<108x1024xf32, #tpu.memory_space<vmem>>, vector<4x1024xf32>
    tpu.vector_store %arg9[%c72, %c0_24], %42 {strides = array<i32>} : memref<108x1024xf32, #tpu.memory_space<vmem>>, vector<4x1024xf32>,
    %44 = vector.extract_strided_slice %5 {offsets = [0, 649], sizes = [4, 1024], strides = [1, 1]} : vector<4x2048xf32> to vector<4x1024xf32>
    %c76 = arith.constant 76 : index
    %c0_25 = arith.constant 0 : index
    %45 = vector.load %arg9[%c76, %c0_25] : memref<108x1024xf32, #tpu.memory_space<vmem>>, vector<4x1024xf32>
    tpu.vector_store %arg9[%c76, %c0_25], %44 {strides = array<i32>} : memref<108x1024xf32, #tpu.memory_space<vmem>>, vector<4x1024xf32>,
    %46 = vector.extract_strided_slice %5 {offsets = [0, 650], sizes = [4, 1024], strides = [1, 1]} : vector<4x2048xf32> to vector<4x1024xf32>
    %c80 = arith.constant 80 : index
    %c0_26 = arith.constant 0 : index
    %47 = vector.load %arg9[%c80, %c0_26] : memref<108x1024xf32, #tpu.memory_space<vmem>>, vector<4x1024xf32>
    tpu.vector_store %arg9[%c80, %c0_26], %46 {strides = array<i32>} : memref<108x1024xf32, #tpu.memory_space<vmem>>, vector<4x1024xf32>,
    %48 = vector.extract_strided_slice %5 {offsets = [0, 666], sizes = [4, 1024], strides = [1, 1]} : vector<4x2048xf32> to vector<4x1024xf32>
    %c84 = arith.constant 84 : index
    %c0_27 = arith.constant 0 : index
    %49 = vector.load %arg9[%c84, %c0_27] : memref<108x1024xf32, #tpu.memory_space<vmem>>, vector<4x1024xf32>
    tpu.vector_store %arg9[%c84, %c0_27], %48 {strides = array<i32>} : memref<108x1024xf32, #tpu.memory_space<vmem>>, vector<4x1024xf32>,
    %50 = vector.extract_strided_slice %5 {offsets = [0, 667], sizes = [4, 1024], strides = [1, 1]} : vector<4x2048xf32> to vector<4x1024xf32>
    %c88 = arith.constant 88 : index
    %c0_28 = arith.constant 0 : index
    %51 = vector.load %arg9[%c88, %c0_28] : memref<108x1024xf32, #tpu.memory_space<vmem>>, vector<4x1024xf32>
    tpu.vector_store %arg9[%c88, %c0_28], %50 {strides = array<i32>} : memref<108x1024xf32, #tpu.memory_space<vmem>>, vector<4x1024xf32>,
    %52 = vector.extract_strided_slice %5 {offsets = [0, 668], sizes = [4, 1024], strides = [1, 1]} : vector<4x2048xf32> to vector<4x1024xf32>
    %c92 = arith.constant 92 : index
    %c0_29 = arith.constant 0 : index
    %53 = vector.load %arg9[%c92, %c0_29] : memref<108x1024xf32, #tpu.memory_space<vmem>>, vector<4x1024xf32>
    tpu.vector_store %arg9[%c92, %c0_29], %52 {strides = array<i32>} : memref<108x1024xf32, #tpu.memory_space<vmem>>, vector<4x1024xf32>,
    %54 = vector.extract_strided_slice %5 {offsets = [0, 684], sizes = [4, 1024], strides = [1, 1]} : vector<4x2048xf32> to vector<4x1024xf32>
    %c96 = arith.constant 96 : index
    %c0_30 = arith.constant 0 : index
    %55 = vector.load %arg9[%c96, %c0_30] : memref<108x1024xf32, #tpu.memory_space<vmem>>, vector<4x1024xf32>
    tpu.vector_store %arg9[%c96, %c0_30], %54 {strides = array<i32>} : memref<108x1024xf32, #tpu.memory_space<vmem>>, vector<4x1024xf32>,
    %56 = vector.extract_strided_slice %5 {offsets = [0, 685], sizes = [4, 1024], strides = [1, 1]} : vector<4x2048xf32> to vector<4x1024xf32>
    %c100 = arith.constant 100 : index
    %c0_31 = arith.constant 0 : index
    %57 = vector.load %arg9[%c100, %c0_31] : memref<108x1024xf32, #tpu.memory_space<vmem>>, vector<4x1024xf32>
    tpu.vector_store %arg9[%c100, %c0_31], %56 {strides = array<i32>} : memref<108x1024xf32, #tpu.memory_space<vmem>>, vector<4x1024xf32>,
    %58 = vector.extract_strided_slice %5 {offsets = [0, 686], sizes = [4, 1024], strides = [1, 1]} : vector<4x2048xf32> to vector<4x1024xf32>
    %c104 = arith.constant 104 : index
    %c0_32 = arith.constant 0 : index
    %59 = vector.load %arg9[%c104, %c0_32] : memref<108x1024xf32, #tpu.memory_space<vmem>>, vector<4x1024xf32>
    tpu.vector_store %arg9[%c104, %c0_32], %58 {strides = array<i32>} : memref<108x1024xf32, #tpu.memory_space<vmem>>, vector<4x1024xf32>,
    %c0_33 = arith.constant 0 : index
    %c0_34 = arith.constant 0 : index
    %60 = vector.load %arg4[%c0_33, %c0_34] : memref<8x108xbf16, #tpu.memory_space<vmem>>, vector<8x108xbf16>
    %61 = arith.extf %60 : vector<8x108xbf16> to vector<8x108xf32>
    %c0_35 = arith.constant 0 : index
    %c0_36 = arith.constant 0 : index
    %62 = vector.load %arg9[%c0_35, %c0_36] : memref<108x1024xf32, #tpu.memory_space<vmem>>, vector<108x1024xf32>
    %cst = arith.constant dense<0.000000e+00> : vector<8x1024xf32>
    %63 = tpu.matmul %61, %62, %cst {dimension_numbers = #tpu.dot_dimension_numbers<[1], [0], [0], [1], [0, 0, 1, 1], [], []>} : vector<8x108xf32>, vector<108x1024xf32>, vector<8x1024xf32> -> vector<8x1024xf32>
    %64 = arith.truncf %63 : vector<8x1024xf32> to vector<8x1024xbf16>
    %c0_37 = arith.constant 0 : index
    %c0_38 = arith.constant 0 : index
    %c0_39 = arith.constant 0 : index
    %65 = vector.load %arg6[%c0_37, %c0_38, %c0_39] : memref<1x8x1024xbf16, #tpu.memory_space<vmem>>, vector<1x8x1024xbf16>
    %66 = vector.shape_cast %65 : vector<1x8x1024xbf16> to vector<8x1024xbf16>
    %67 = vector.shape_cast %64 : vector<8x1024xbf16> to vector<1x8x1024xbf16>
    tpu.vector_store %arg6[%c0_37, %c0_38, %c0_39], %67 {strides = array<i32>} : memref<1x8x1024xbf16, #tpu.memory_space<vmem>>, vector<1x8x1024xbf16>,
    %c0_40 = arith.constant 0 : index
    %c0_41 = arith.constant 0 : index
    %68 = vector.load %arg5[%c0_40, %c0_41] : memref<1x1024xf32, #tpu.memory_space<vmem>>, vector<1x1024xf32>
    %69 = vector.shape_cast %68 : vector<1x1024xf32> to vector<1x1x1024xf32>
    %cst_42 = arith.constant dense<0.000000e+00> : vector<1xf32>
    %70 = vector.multi_reduction <add>, %69, %cst_42 [1, 2] : vector<1x1x1024xf32> to vector<1xf32>
    %71 = vector.shape_cast %70 : vector<1xf32> to vector<1x1x1xf32>
    %72 = vector.extract %71[0, 0, 0] : f32 from vector<1x1x1xf32>
    %73 = vector.broadcast %68 : vector<1x1024xf32> to vector<8x1024xf32>
    %74 = arith.mulf %63, %73 : vector<8x1024xf32>
    %cst_43 = arith.constant dense<0.000000e+00> : vector<8xf32>
    %75 = vector.multi_reduction <add>, %74, %cst_43 [1] : vector<8x1024xf32> to vector<8xf32>
    %76 = vector.shape_cast %75 : vector<8xf32> to vector<8x1xf32>
    %cst_44 = arith.constant 1.000000e+00 : f32
    %77 = arith.maximumf %72, %cst_44 : f32
    %cst_45 = arith.constant 1.000000e+00 : f32
    %78 = arith.divf %cst_45, %77 : f32
    %79 = vector.broadcast %78 : f32 to vector<8x1xf32>
    %80 = arith.mulf %76, %79 : vector<8x1xf32>
    %81 = vector.broadcast %80 : vector<8x1xf32> to vector<8x1024xf32>
    %82 = arith.subf %63, %81 : vector<8x1024xf32>
    %83 = vector.broadcast %68 : vector<1x1024xf32> to vector<8x1024xf32>
    %84 = arith.mulf %82, %83 : vector<8x1024xf32>
    %c0_46 = arith.constant 0 : index
    %c0_47 = arith.constant 0 : index
    %c0_48 = arith.constant 0 : index
    %85 = vector.load %arg7[%c0_46, %c0_47, %c0_48] : memref<1x8x1xf32, #tpu.memory_space<vmem>>, vector<1x8x1xf32>
    %86 = vector.shape_cast %85 : vector<1x8x1xf32> to vector<8x1xf32>
    %87 = vector.shape_cast %76 : vector<8x1xf32> to vector<1x8x1xf32>
    tpu.vector_store %arg7[%c0_46, %c0_47, %c0_48], %87 {strides = array<i32>} : memref<1x8x1xf32, #tpu.memory_space<vmem>>, vector<1x8x1xf32>,
    %88 = arith.mulf %84, %84 : vector<8x1024xf32>
    %cst_49 = arith.constant dense<0.000000e+00> : vector<8xf32>
    %89 = vector.multi_reduction <add>, %88, %cst_49 [1] : vector<8x1024xf32> to vector<8xf32>
    %90 = vector.shape_cast %89 : vector<8xf32> to vector<8x1xf32>
    %c0_50 = arith.constant 0 : index
    %c0_51 = arith.constant 0 : index
    %c0_52 = arith.constant 0 : index
    %91 = vector.load %arg8[%c0_50, %c0_51, %c0_52] : memref<1x8x1xf32, #tpu.memory_space<vmem>>, vector<1x8x1xf32>
    %92 = vector.shape_cast %91 : vector<1x8x1xf32> to vector<8x1xf32>
    %93 = vector.shape_cast %90 : vector<8x1xf32> to vector<1x8x1xf32>
    tpu.vector_store %arg8[%c0_50, %c0_51, %c0_52], %93 {strides = array<i32>} : memref<1x8x1xf32, #tpu.memory_space<vmem>>, vector<1x8x1xf32>,
    return
  }
  func.func @transform_0(%arg0: i32, %arg1: i32) -> (i32, i32, i32) {
    %c0_i32 = arith.constant 0 : i32
    %c0_i32_0 = arith.constant 0 : i32
    return %arg0, %c0_i32, %arg1 : i32, i32, i32
  }
  func.func @transform_1(%arg0: i32, %arg1: i32) -> (i32, i32, i32) {
    %c1_i32 = arith.constant 1 : i32
    %0 = arith.addi %arg1, %c1_i32 : i32
    %c0_i32 = arith.constant 0 : i32
    %c0_i32_0 = arith.constant 0 : i32
    return %arg0, %c0_i32, %0 : i32, i32, i32
  }
  func.func @transform_2(%arg0: i32, %arg1: i32) -> (i32, i32) {
    %c0_i32 = arith.constant 0 : i32
    %c0_i32_0 = arith.constant 0 : i32
    %c0_i32_1 = arith.constant 0 : i32
    return %c0_i32, %c0_i32_0 : i32, i32
  }
  func.func @transform_3(%arg0: i32, %arg1: i32) -> (i32, i32) {
    %c0_i32 = arith.constant 0 : i32
    %c0_i32_0 = arith.constant 0 : i32
    return %c0_i32, %arg1 : i32, i32
  }
  func.func @transform_4(%arg0: i32, %arg1: i32) -> (i32, i32, i32) {
    %c0_i32 = arith.constant 0 : i32
    %c0_i32_0 = arith.constant 0 : i32
    return %arg0, %c0_i32, %arg1 : i32, i32, i32
  }
  func.func @transform_5(%arg0: i32, %arg1: i32) -> (i32, i32, i32) {
    %c3_i32 = arith.constant 3 : i32
    %0 = arith.muli %arg0, %c3_i32 : i32
    %1 = arith.addi %0, %arg1 : i32
    %c0_i32 = arith.constant 0 : i32
    %c0_i32_0 = arith.constant 0 : i32
    %c0_i32_1 = arith.constant 0 : i32
    return %1, %c0_i32, %c0_i32_0 : i32, i32, i32
  }
  func.func @transform_6(%arg0: i32, %arg1: i32) -> (i32, i32, i32) {
    %c3_i32 = arith.constant 3 : i32
    %0 = arith.muli %arg0, %c3_i32 : i32
    %1 = arith.addi %0, %arg1 : i32
    %c0_i32 = arith.constant 0 : i32
    %c0_i32_0 = arith.constant 0 : i32
    %c0_i32_1 = arith.constant 0 : i32
    return %1, %c0_i32, %c0_i32_0 : i32, i32, i32
  }
}

</mosaic_0001>

<bundles_post_ra>
// kernel: conv_bn_relu_3d.1
= control target key start
LH: loop header
LB: loop body
LE: loop exit
PB: predicated region body
PF: predicated region fallthrough
CT: control target
= control target key end

     0   :  { %s2952_s21 = smov 0   ;;  %s2954_s22 = smov 0   ;;  %s4163_s0 = inlined_call_operand.vmem [shape: bf16[2,4,4096], index: 0, kind: input, shape index: {}, may-alias: {0,1}]   ;;  %s4164_s1 = inlined_call_operand.vmem [shape: bf16[2,4,4096], index: 1, kind: input, shape index: {}, may-alias: {0,1}]   ;;  %s4165_s2 = inlined_call_operand.vmem [shape: bf16[8,108], index: 2, kind: input, shape index: {}]   ;;  %s4166_s3 = inlined_call_operand.vmem [shape: f32[1,3072], index: 3, kind: input, shape index: {}]   ;;  %s4167_s4 = inlined_call_operand.vmem [shape: bf16[2,8,3072], index: 4, kind: output, shape index: {0}]   ;;  %s4168_s5 = inlined_call_operand.vmem [shape: f32[6,8,1], index: 5, kind: output, shape index: {1}]   ;;  %s4169_s6 = inlined_call_operand.vmem [shape: f32[6,8,1], index: 6, kind: output, shape index: {2}]  }
   0x1   :  { %s2956_s23 = smov 0   ;;  %s2958_s24 = smov 0  }
   0x2   :  { %s2960_s25 = smov 0  }
   0x3 LB: > { %s26_s26 = sadd.s32 1, %s2880_s23  ;;  %s29_s27 = sadd.s32 1, %s2884_s24  ;;  %s2888_s25 = sphi %s2960_s25, %s17_s25   ;;  %s2884_s24 = sphi %s2958_s24, %s4173_s24   ;;  %s2880_s23 = sphi %s2956_s23, %s4172_s23   ;;  %s2876_s22 = sphi %s2954_s22, %s4171_s22   ;;  %s2872_s21 = sphi %s2952_s21, %s4170_s21  }
   0x4   : > { %p27_p0 = scmp.ge.s32.totalorder %s26_s26, 3  ;;  %p2224_p1 = scmp.ge.s32.totalorder %s2888_s25, 1 }
   0x5   : > { %p277_p2 = scmp.lt.s32.totalorder %s2888_s25, 7 }
   0x6   : > { %s4175_s26 = smov (%p27_p0, %s26_s26), 0  ;;  %s4177_s27 = smov (!%p27_p0, %s29_s27), %s2884_s24 }
   0x7   : > { %p278_p3 = pnand %p2224_p1, %p277_p2  ;;  %p31_p4 = scmp.ge.s32.totalorder %s4177_s27, 2 }
   0x8   : > { %s2987_s28 = sshll.u32 (!%p278_p3), %s2872_s21, 3  ;;  %p342_p5 = scmp.lt.s32.totalorder (!%p278_p3), %s2876_s22, 1 }
   0x9   : > { %s4179_s27 = smov (%p31_p4, %s4177_s27), 0  ;;  %281 = sbr.rel (%p278_p3) target bundleno = 909 (0x38d), region = 36 }
   0xa   : > { %p344_p6 = scmp.lt.s32.totalorder (!%p278_p3), %s2987_s28, 31  ;;  %s2255_s8 = sadd.s32 (!%p278_p3), 8, %s2987_s28 }
   0xb   : > { %p355_p7 = scmp.lt.s32.totalorder (!%p278_p3), %s2255_s8, 31  ;;  %s2890_s19 = smov (!%p278_p3), 126  }
   0xc   : > { %s2891_s20 = smov (!%p278_p3), 127   ;;  %s2897_s11 = smov (!%p278_p3), 90  }
   0xd   : > { %s2898_s12 = smov (!%p278_p3), 60   ;;  %s2902_s16 = smov (!%p278_p3), 41  }
   0xe   : > { %s2992_s29 = scalar_select %p342_p5, %s2876_s22, 1  ;;  %vm537_vm0 = vcmask 1031168   ;;  %vm580_vm1 = vcmask 900096   ;;  %vm494_vm2 = vcmask 1039360   ;;  %vm623_vm3 = vcmask 891904  }
   0xf   : > { %s345_s30 = scalar_select %p344_p6, %s2987_s28, 31  ;;  %vm666_vm4 = vcmask 883712   ;;  %vm709_vm5 = vcmask 752640   ;;  %vm752_vm6 = vcmask 744448   ;;  %vm795_vm7 = vcmask 736256  }
  0x10   : > { %s2226_s7 = sshll.u32 %s2992_s29, 5  ;;  %s4181_s8 = smov (!%p355_p7, %s2255_s8), 31  ;;  %vm842_vm8 = vcmask 490496   ;;  %vm885_vm9 = vcmask 482304   ;;  %vm928_vm10 = vcmask 474112   ;;  %vm971_vm11 = vcmask 343040  }
  0x11   : > { %s347_s9 = sadd.s32 %s2226_s7, %s345_s30  ;;  %s358_s14 = sadd.s32 %s2226_s7, %s4181_s8  ;;  %vm1014_vm12 = vcmask 334848   ;;  %vm1057_vm13 = vcmask 326656   ;;  %vm1100_vm14 = vcmask 195584   ;;  %vm1579_vm15 = vcmask 670720  }
  0x12   : > { %s2227_s10 = sshll.u32 %s347_s9, 1  ;;  %s2230_s15 = sshll.u32 %s358_s14, 1 }
  0x13   : > { %s349_s13 = scalar_lea.vmem %s4163_s0, %s2227_s10  ;;  %s360_s18 = scalar_lea.vmem %s4164_s1, %s2230_s15 }
  0x14   : > { %v395_v0 = vld [vmem:[%s349_s13 + $0x8] sm:$0xff]  ;;  %v394_v1 = vld [vmem:[%s349_s13] sm:$0xff]  ;;  %s2892_s30 = smov 110   ;;  %s2893_s7 = smov 109  }
  0x15   : > { %402 = vst [vmem:[#allocation1 + $0x20] ss:$4 sm:$0xff] %v395_v0  ;;  %v397_v17 = vld [vmem:[%s360_s18 + $0x8] sm:$0xff]  ;;  %v396_v19 = vld [vmem:[%s360_s18] sm:$0xff]  ;;  %s2894_s8 = smov 108   ;;  %s2895_s9 = smov 92  }
  0x16   : > { %399 = vst [vmem:[#allocation1] ss:$4 sm:$0xff] %v394_v1  ;;  %s2896_s10 = smov 91   ;;  %s2899_s13 = smov 59  }
  0x17   : > { %s2900_s14 = smov 58   ;;  %s2901_s15 = smov 42  }
  0x18   : > { %s2903_s17 = smov 40   ;;  %s2904_s18 = smov 24  }
  0x19   : > { %p364_p8 = scmp.lt.s32.totalorder %s2987_s28, 23 }
  0x1b   : > { %s4183_s28 = smov (!%p364_p8, %s2987_s28), 23 }
  0x1c   : > { %v407_v2 = vld.sshfl [vmem:[#allocation1 + $0x20] sm:$0xff pattern:$0x73625140]  ;;  %v408_v3 = vld.sshfl [vmem:[#allocation1 + $0x28] sm:$0xff pattern:$0x73625140] }
  0x1d   : > { %v440_v4 = vunpack.c.l.bf16 %v407_v2  ;;  %v3000_v5 = vunpack.c.l.bf16 %v408_v3  ;;  %v405_v6 = vld.sshfl [vmem:[#allocation1 + $0x10] sm:$0xff pattern:$0x73625140]  ;;  %v406_v7 = vld.sshfl [vmem:[#allocation1 + $0x18] sm:$0xff pattern:$0x73625140] }
  0x1e   : > { %v438_v8 = vunpack.c.l.bf16 %v405_v6  ;;  %v439_v9 = vunpack.c.l.bf16 %v406_v7  ;;  %v403_v10 = vld.sshfl [vmem:[#allocation1] sm:$0xff pattern:$0x73625140]  ;;  %v404_v11 = vld.sshfl [vmem:[#allocation1 + $0x8] sm:$0xff pattern:$0x73625140] }
  0x1f   : > { %v3006_v12 = vpack.i.bf16 %v3000_v5, %v440_v4  ;;  %454 = vst [vmem:[#allocation2 + $0x360] sm:$0xf] %v440_v4  ;;  %v409_v13 = vld.sshfl [vmem:[#allocation1 + $0x30] sm:$0xff pattern:$0x73625140]  ;;  %v436_v14 = vunpack.c.l.bf16 %v403_v10  ;;  %v437_v15 = vunpack.c.l.bf16 %v404_v11  ;;  %v471_v21 = vrot.slane %v440_v4, 4 }
  0x20   : > { %455 = vst [vmem:[#allocation2 + $0x328] sm:$0xf] %v3000_v5  ;;  %v3009_v16 = vpack.i.bf16 %v439_v9, %v438_v8  ;;  %v410_v18 = vld.sshfl [vmem:[#allocation1 + $0x38] sm:$0xff pattern:$0x73625140]  ;;  %v472_v22 = vrot.slane %v3000_v5, 4  ;;  %v3018_v25 = vunpack.c.l.bf16 %v409_v13 }
  0x21   : > { %2339 = vrot.lane.b32.xlu1 %v3006_v12, %s2890_s19  ;;  %452 = vst [vmem:[#allocation2 + $0x10] sm:$0xf] %v438_v8  ;;  %v3013_v20 = vpack.i.bf16 %v437_v15, %v436_v14  ;;  %v467_v23 = vrot.slane %v436_v14, 4  ;;  %v468_v24 = vrot.slane %v437_v15, 4  ;;  %v3020_v26 = vunpack.c.l.bf16 %v410_v18 }
  0x22   : > { %2334 = vrot.lane.b32.xlu0 %v3009_v16, %s2890_s19  ;;  %453 = vst [vmem:[#allocation2 + $0x48] sm:$0xf] %v439_v9  ;;  %v3026_v27 = vpack.i.bf16 %v472_v22, %v471_v21  ;;  %v3036_v30 = vrot.slane %v3018_v25, 4  ;;  %v469_v32 = vrot.slane %v438_v8, 4  ;;  %v470_v33 = vrot.slane %v439_v9, 4 }
  0x23   : > { %423 = vst [vmem:[#allocation1 + $0x20] ss:$4 sm:$0xff] %v397_v17  ;;  %2329 = vrot.lane.b32.xlu2 %v3013_v20, %s2890_s19  ;;  %v2348_v28 = vpack.i.bf16 %v468_v24, %v467_v23  ;;  %v3031_v29 = vpack.i.bf16 %v3020_v26, %v3018_v25  ;;  %v3039_v31 = vrot.slane %v3020_v26, 4 }
  0x24   : > { %420 = vst [vmem:[#allocation1] ss:$4 sm:$0xff] %v396_v19  ;;  %v3047_v35 = vpack.i.bf16 %v470_v33, %v469_v32 }
  0x25   : > { %450 = vst [vmem:[#allocation2 + $0x2b0] sm:$0xf] %v436_v14  ;;  %v3045_v34 = vpack.i.bf16 %v3039_v31, %v3036_v30 }
  0x26   : > { %451 = vst [vmem:[#allocation2 + $0xd0] sm:$0xf] %v437_v15 }
  0x27   : > { %456 = vst [vmem:[#allocation2 + $0x40] sm:$0xf] %v3018_v25 }
  0x28   : > { %457 = vst [vmem:[#allocation2 + $0x378] sm:$0xf] %v3020_v26 }
  0x29   : > { %2359 = vrot.lane.b32.xlu1 %v3026_v27, %s2891_s20 }
  0x2a   : > { %2349 = vrot.lane.b32.xlu0 %v2348_v28, %s2891_s20 }
  0x2b   : > { %2344 = vrot.lane.b32.xlu2 %v3031_v29, %s2890_s19  ;;  %v424_v36 = vld.sshfl [vmem:[#allocation1] sm:$0xff pattern:$0x73625140]  ;;  %v425_v43 = vld.sshfl [vmem:[#allocation1 + $0x8] sm:$0xff pattern:$0x73625140] }
  0x2c   : > { %v3051_v37 = vunpack.c.l.bf16 %v424_v36  ;;  %v3086_v44 = vunpack.c.l.bf16 %v425_v43  ;;  %v426_v48 = vld.sshfl [vmem:[#allocation1 + $0x10] sm:$0xff pattern:$0x73625140] }
  0x2d   : > { %v3100_v51 = vunpack.c.l.bf16 %v426_v48 }
  0x2e   : > { %v3055_v38 = vrot.slane %v3051_v37, 4  ;;  %v3097_v50 = vrot.slane %v3086_v44, 4  ;;  %v3135_v17 = vpack.i.bf16 %v3086_v44, %v3051_v37 }
  0x2f   : > { %v3112_v56 = vrot.slane %v3100_v51, 4 }
  0x30   : > { %v3107_v53 = vpack.i.bf16 %v3097_v50, %v3055_v38 }
  0x31   : > { %2364 = vrot.lane.b32.xlu1 %v3045_v34, %s2891_s20 }
  0x32   : > { %2354 = vrot.lane.b32.xlu0 %v3047_v35, %s2891_s20 }
  0x33   : > { %2374 = vrot.lane.b32.xlu2 %v3047_v35, %s2892_s30 }
  0x39   : > { %2369 = vrot.lane.b32.xlu1 %v2348_v28, %s2892_s30 }
  0x3a   : > { %535 = vrot.lane.b32.xlu0 %v3051_v37, %s2890_s19  ;;  %s2905_s19 = smov 82  }
  0x3b   : > { %492 = vrot.lane.b32.xlu2 %v3055_v38, %s2891_s20  ;;  %s2906_s20 = smov 83  }
  0x41   : > { %2384 = vrot.lane.b32.xlu1 %v3045_v34, %s2892_s30 }
  0x42   : > { %2379 = vrot.lane.b32.xlu0 %v3026_v27, %s2892_s30 }
  0x43   : > { %578 = vrot.lane.b32.xlu2 %v3055_v38, %s2892_s30  ;;  %s2907_s30 = smov 84  }
  0x49   : > { %2394 = vrot.lane.b32.xlu1 %v3009_v16, %s2893_s7 }
  0x4a   : > { %2389 = vrot.lane.b32.xlu0 %v3013_v20, %s2893_s7 }
  0x4b   : > { %2399 = vrot.lane.b32.xlu2 %v3006_v12, %s2893_s7 }
  0x51   : > { %621 = vrot.lane.b32.xlu1 %v3051_v37, %s2893_s7 }
  0x52   : > { %2404 = vrot.lane.b32.xlu0 %v3031_v29, %s2893_s7  ;;  %s2908_s7 = smov 101  }
  0x53   : > { %2409 = vrot.lane.b32.xlu2 %v2348_v28, %s2894_s8 }
  0x59   : > { %2419 = vrot.lane.b32.xlu1 %v3026_v27, %s2894_s8 }
  0x5a   : > { %2414 = vrot.lane.b32.xlu0 %v3047_v35, %s2894_s8 }
  0x5b   : > { %2424 = vrot.lane.b32.xlu2 %v3045_v34, %s2894_s8 }
  0x61   : > { %2429 = vrot.lane.b32.xlu1 %v3013_v20, %s2895_s9 }
  0x62   : > { %664 = vrot.lane.b32.xlu0 %v3055_v38, %s2894_s8  ;;  %s2909_s8 = smov 100  }
  0x63   : > { %2434 = vrot.lane.b32.xlu2 %v3009_v16, %s2895_s9 }
  0x69   : > { %2444 = vrot.lane.b32.xlu1 %v3031_v29, %s2895_s9 }
  0x6a   : > { %2439 = vrot.lane.b32.xlu0 %v3006_v12, %s2895_s9 }
  0x6b   : > { %707 = vrot.lane.b32.xlu2 %v3051_v37, %s2895_s9  ;;  %s2910_s9 = smov 118  }
  0x71   : > { %2454 = vrot.lane.b32.xlu1 %v3047_v35, %s2896_s10 }
  0x72   : > { %2449 = vrot.lane.b32.xlu0 %v2348_v28, %s2896_s10 }
  0x73   : > { %2459 = vrot.lane.b32.xlu2 %v3026_v27, %s2896_s10 }
  0x79   : > { %750 = vrot.lane.b32.xlu1 %v3055_v38, %s2896_s10 }
  0x7a   : > { %2464 = vrot.lane.b32.xlu0 %v3045_v34, %s2896_s10  ;;  %s2911_s10 = smov 102  }
  0x7b   : > { %2469 = vrot.lane.b32.xlu2 %v3013_v20, %s2897_s11 }
  0x7d   : > { %v2330_v39 = vpop.permute.xlu2 %2329 }
  0x7e   : > { %v2332_v40 = vunpack.i.h.bf16 %v2330_v39  ;;  %v2331_v41 = vunpack.i.l.bf16 %v2330_v39 }
  0x80   : > { %v538_v42 = vsel %vm537_vm0, %v2331_v41, %v2332_v40 }
  0x81   : > { %554 = vst [vmem:[#allocation2 + $0x108] sm:$0xf] %v538_v42  ;;  %2479 = vrot.lane.b32.xlu1 %v3006_v12, %s2897_s11 }
  0x82   : > { %2474 = vrot.lane.b32.xlu0 %v3009_v16, %s2897_s11 }
  0x83   : > { %2484 = vrot.lane.b32.xlu2 %v3031_v29, %s2897_s11 }
  0x85   : > { %v3088_v45 = vpop.permute.xlu2 %2344 }
  0x86   : > { %v2347_v46 = vunpack.i.h.bf16 %v3088_v45  ;;  %v2346_v47 = vunpack.i.l.bf16 %v3088_v45 }
  0x88   : > { %v544_v49 = vsel %vm537_vm0, %v2346_v47, %v2347_v46 }
  0x89   : > { %560 = vst [vmem:[#allocation2 + $0x58] sm:$0xf] %v544_v49  ;;  %2489 = vrot.lane.b32.xlu1 %v3047_v35, %s2898_s12 }
  0x8a   : > { %793 = vrot.lane.b32.xlu0 %v3051_v37, %s2897_s11  ;;  %s2912_s11 = smov 120  }
  0x8b   : > { %2494 = vrot.lane.b32.xlu2 %v3026_v27, %s2898_s12 }
  0x8d   : > { %v3103_v52 = vpop.permute.xlu2 %2374 }
  0x8e   : > { %v2377_v54 = vunpack.i.h.bf16 %v3103_v52  ;;  %v2376_v55 = vunpack.i.l.bf16 %v3103_v52 }
  0x90   : > { %v583_v57 = vsel %vm580_vm1, %v2376_v55, %v2377_v54 }
  0x91   : > { %599 = vst [vmem:[#allocation2 + $0x90] sm:$0xf0] %v583_v57  ;;  %2504 = vrot.lane.b32.xlu1 %v3107_v53, %s2898_s12 }
  0x92   : > { %2499 = vrot.lane.b32.xlu0 %v3045_v34, %s2898_s12 }
  0x93   : > { %840 = vrot.lane.b32.xlu2 %v3112_v56, %s2898_s12  ;;  %v2340_v58 = vpop.permute.xlu1 %2339  ;;  %s2913_s12 = smov 119  }
  0x94   : > { %v2342_v59 = vunpack.i.h.bf16 %v2340_v58  ;;  %v2341_v60 = vunpack.i.l.bf16 %v2340_v58  ;;  %v2335_v61 = vpop.permute.xlu0 %2334 }
  0x95   : > { %v2337_v62 = vunpack.i.h.bf16 %v2335_v61  ;;  %v2336_v63 = vunpack.i.l.bf16 %v2335_v61  ;;  %v493_v0 = vpop.permute.xlu2 %492 }
  0x96   : > { %v542_v1 = vsel %vm537_vm0, %v2341_v60, %v2342_v59  ;;  %v543_v2 = vsel %vm537_vm0, %v2342_v59, %v2346_v47 }
  0x97   : > { %558 = vst [vmem:[#allocation2 + $0x148] sm:$0xf] %v542_v1  ;;  %v541_v3 = vsel %vm537_vm0, %v2337_v62, %v2341_v60  ;;  %v539_v4 = vsel %vm537_vm0, %v2332_v40, %v2336_v63  ;;  %v540_v6 = vsel %vm537_vm0, %v2336_v63, %v2337_v62 }
  0x98   : > { %559 = vst [vmem:[#allocation2 + $0x100] sm:$0xf] %v543_v2 }
  0x99   : > { %557 = vst [vmem:[#allocation2 + $0x318] sm:$0xf] %v541_v3  ;;  %2514 = vrot.lane.b32.xlu1 %v3006_v12, %s2899_s13 }
  0x9a   : > { %555 = vst [vmem:[#allocation2 + $0x110] sm:$0xf] %v539_v4  ;;  %2509 = vrot.lane.b32.xlu0 %v3009_v16, %s2899_s13 }
  0x9b   : > { %556 = vst [vmem:[#allocation2 + $0x90] sm:$0xf] %v540_v6  ;;  %2519 = vrot.lane.b32.xlu2 %v3031_v29, %s2899_s13  ;;  %v2360_v7 = vpop.permute.xlu1 %2359 }
  0x9c   : > { %v2362_v8 = vunpack.i.h.bf16 %v2360_v7  ;;  %v2361_v9 = vunpack.i.l.bf16 %v2360_v7  ;;  %v2350_v10 = vpop.permute.xlu0 %2349 }
  0x9d   : > { %v2352_v11 = vunpack.i.h.bf16 %v2350_v10  ;;  %v2351_v13 = vunpack.i.l.bf16 %v2350_v10  ;;  %v3130_v14 = vpop.permute.xlu2 %578 }
  0x9e   : > { %v499_v15 = vsel %vm494_vm2, %v2361_v9, %v2362_v8 }
  0x9f   : > { %515 = vst [vmem:[#allocation2 + $0x360] sm:$0xf0] %v499_v15  ;;  %v495_v18 = vsel %vm494_vm2, %v2351_v13, %v2352_v11 }
  0xa0   : > { %511 = vst [vmem:[#allocation2 + $0x2b0] sm:$0xf0] %v495_v18 }
  0xa1   : > { %883 = vrot.lane.b32.xlu1 %v3100_v51, %s2899_s13 }
  0xa2   : > { %2524 = vrot.lane.b32.xlu0 %v3135_v17, %s2899_s13  ;;  %s2914_s13 = smov 23  }
  0xa3   : > { %2529 = vrot.lane.b32.xlu2 %v3047_v35, %s2900_s14  ;;  %v2365_v19 = vpop.permute.xlu1 %2364 }
  0xa4   : > { %v2367_v20 = vunpack.i.h.bf16 %v2365_v19  ;;  %v2366_v21 = vunpack.i.l.bf16 %v2365_v19  ;;  %v2355_v23 = vpop.permute.xlu0 %2354 }
  0xa5   : > { %v2357_v24 = vunpack.i.h.bf16 %v2355_v23  ;;  %v2356_v28 = vunpack.i.l.bf16 %v2355_v23  ;;  %v3142_v32 = vpop.permute.xlu2 %2399 }
  0xa6   : > { %v500_v33 = vsel %vm494_vm2, %v2362_v8, %v2366_v21  ;;  %v501_v36 = vsel %vm494_vm2, %v2366_v21, %v2367_v20  ;;  %v502_v39 = vsel %vm494_vm2, %v2367_v20, %v493_v0  ;;  %v2402_v40 = vunpack.i.h.bf16 %v3142_v32 }
  0xa7   : > { %516 = vst [vmem:[#allocation2 + $0x328] sm:$0xf0] %v500_v33  ;;  %v498_v41 = vsel %vm494_vm2, %v2357_v24, %v2361_v9  ;;  %v2401_v42 = vunpack.i.l.bf16 %v3142_v32  ;;  %v496_v43 = vsel %vm494_vm2, %v2352_v11, %v2356_v28  ;;  %v497_v47 = vsel %vm494_vm2, %v2356_v28, %v2357_v24 }
  0xa8   : > { %517 = vst [vmem:[#allocation2 + $0x40] sm:$0xf0] %v501_v36  ;;  %vm1536_vm2 = vcmask 678912  }
  0xa9   : > { %518 = vst [vmem:[#allocation2 + $0x378] sm:$0xf0] %v502_v39  ;;  %2539 = vrot.lane.b32.xlu1 %v3045_v34, %s2900_s14  ;;  %v628_v48 = vsel %vm623_vm3, %v2401_v42, %v2402_v40 }
  0xaa   : > { %514 = vst [vmem:[#allocation2 + $0x48] sm:$0xf0] %v498_v41  ;;  %2534 = vrot.lane.b32.xlu0 %v3026_v27, %s2900_s14 }
  0xab   : > { %512 = vst [vmem:[#allocation2 + $0xd0] sm:$0xf0] %v496_v43  ;;  %2544 = vrot.lane.b32.xlu2 %v3107_v53, %s2900_s14  ;;  %v2370_v49 = vpop.permute.xlu1 %2369 }
  0xac   : > { %513 = vst [vmem:[#allocation2 + $0x10] sm:$0xf0] %v497_v47  ;;  %v2372_v57 = vunpack.i.h.bf16 %v2370_v49  ;;  %v2371_v58 = vunpack.i.l.bf16 %v2370_v49  ;;  %v536_v59 = vpop.permute.xlu0 %535 }
  0xad   : > { %644 = vst [vmem:[#allocation2 + $0x1a8] sm:$0xf] %v628_v48  ;;  %v545_v60 = vsel %vm537_vm0, %v2347_v46, %v536_v59  ;;  %v3166_v61 = vpop.permute.xlu2 %2409  ;;  %vm1721_vm0 = vcmask 1043456  }
  0xae   : > { %v582_v62 = vsel %vm580_vm1, %v2372_v57, %v2376_v55  ;;  %v581_v63 = vsel %vm580_vm1, %v2371_v58, %v2372_v57  ;;  %561 = vst [vmem:[#allocation2 + $0x2d8] sm:$0xf] %v545_v60  ;;  %v2412_v0 = vunpack.i.h.bf16 %v3166_v61  ;;  %v2411_v1 = vunpack.i.l.bf16 %v3166_v61 }
  0xaf   : > { %598 = vst [vmem:[#allocation2 + $0x110] sm:$0xf0] %v582_v62 }
  0xb0   : > { %597 = vst [vmem:[#allocation2 + $0x108] sm:$0xf0] %v581_v63  ;;  %v667_v45 = vsel %vm666_vm4, %v2411_v1, %v2412_v0 }
  0xb1   : > { %683 = vst [vmem:[#allocation2 + $0x28] sm:$0xf0] %v667_v45  ;;  %2549 = vrot.lane.b32.xlu1 %v3009_v16, %s2901_s15 }
  0xb2   : > { %926 = vrot.lane.b32.xlu0 %v3112_v56, %s2900_s14  ;;  %s2915_s14 = smov 22  }
  0xb3   : > { %2554 = vrot.lane.b32.xlu2 %v3006_v12, %s2901_s15  ;;  %v2385_v46 = vpop.permute.xlu1 %2384 }
  0xb4   : > { %v2387_v55 = vunpack.i.h.bf16 %v2385_v46  ;;  %v2386_v2 = vunpack.i.l.bf16 %v2385_v46  ;;  %v2380_v3 = vpop.permute.xlu0 %2379 }
  0xb5   : > { %v2382_v4 = vunpack.i.h.bf16 %v2380_v3  ;;  %v2381_v6 = vunpack.i.l.bf16 %v2380_v3  ;;  %v3181_v7 = vpop.permute.xlu2 %2424 }
  0xb6   : > { %v587_v8 = vsel %vm580_vm1, %v2386_v2, %v2387_v55  ;;  %v588_v9 = vsel %vm580_vm1, %v2387_v55, %v3130_v14  ;;  %v2427_v10 = vunpack.i.h.bf16 %v3181_v7  ;;  %v2426_v11 = vunpack.i.l.bf16 %v3181_v7 }
  0xb7   : > { %603 = vst [vmem:[#allocation2 + $0x58] sm:$0xf0] %v587_v8  ;;  %v586_v13 = vsel %vm580_vm1, %v2382_v4, %v2386_v2  ;;  %v584_v15 = vsel %vm580_vm1, %v2377_v54, %v2381_v6  ;;  %v585_v18 = vsel %vm580_vm1, %v2381_v6, %v2382_v4  ;;  %vm1450_vm1 = vcmask 818176  }
  0xb8   : > { %604 = vst [vmem:[#allocation2 + $0x2d8] sm:$0xf0] %v588_v9  ;;  %v673_v14 = vsel %vm666_vm4, %v2426_v11, %v2427_v10 }
  0xb9   : > { %602 = vst [vmem:[#allocation2 + $0x100] sm:$0xf0] %v586_v13  ;;  %2564 = vrot.lane.b32.xlu1 %v3135_v17, %s2901_s15 }
  0xba   : > { %600 = vst [vmem:[#allocation2 + $0x318] sm:$0xf0] %v584_v15  ;;  %2559 = vrot.lane.b32.xlu0 %v3031_v29, %s2901_s15 }
  0xbb   : > { %601 = vst [vmem:[#allocation2 + $0x148] sm:$0xf0] %v585_v18  ;;  %969 = vrot.lane.b32.xlu2 %v3100_v51, %s2901_s15  ;;  %v2395_v52 = vpop.permute.xlu1 %2394 }
  0xbc   : > { %689 = vst [vmem:[#allocation2 + $0x2e0] sm:$0xf0] %v673_v14  ;;  %v2397_v54 = vunpack.i.h.bf16 %v2395_v52  ;;  %v2396_v19 = vunpack.i.l.bf16 %v2395_v52  ;;  %v2390_v20 = vpop.permute.xlu0 %2389 }
  0xbd   : > { %v2392_v21 = vunpack.i.h.bf16 %v2390_v20  ;;  %v2391_v23 = vunpack.i.l.bf16 %v2390_v20  ;;  %v3201_v24 = vpop.permute.xlu2 %2434 }
  0xbe   : > { %v626_v28 = vsel %vm623_vm3, %v2396_v19, %v2397_v54  ;;  %v627_v33 = vsel %vm623_vm3, %v2397_v54, %v2401_v42  ;;  %v2437_v36 = vunpack.i.h.bf16 %v3201_v24  ;;  %v2436_v39 = vunpack.i.l.bf16 %v3201_v24 }
  0xbf   : > { %642 = vst [vmem:[#allocation2 + $0x2d0] sm:$0xf] %v626_v28  ;;  %v625_v41 = vsel %vm623_vm3, %v2392_v21, %v2396_v19  ;;  %v624_v43 = vsel %vm623_vm3, %v2391_v23, %v2392_v21 }
  0xc0   : > { %643 = vst [vmem:[#allocation2 + $0x198] sm:$0xf] %v627_v33  ;;  %v712_v47 = vsel %vm709_vm5, %v2436_v39, %v2437_v36 }
  0xc1   : > { %641 = vst [vmem:[#allocation2 + $0x330] sm:$0xf] %v625_v41  ;;  %2574 = vrot.lane.b32.xlu1 %v3026_v27, %s2902_s16 }
  0xc2   : > { %640 = vst [vmem:[#allocation2 + $0x28] sm:$0xf] %v624_v43  ;;  %2569 = vrot.lane.b32.xlu0 %v3047_v35, %s2902_s16 }
  0xc3   : > { %728 = vst [vmem:[#allocation2 + $0x1a0] sm:$0xf] %v712_v47  ;;  %2579 = vrot.lane.b32.xlu2 %v3045_v34, %s2902_s16  ;;  %v622_v42 = vpop.permute.xlu1 %621 }
  0xc4   : > { %v2405_v48 = vpop.permute.xlu0 %2404 }
  0xc5   : > { %v2407_v49 = vunpack.i.h.bf16 %v2405_v48  ;;  %v2406_v57 = vunpack.i.l.bf16 %v2405_v48  ;;  %v3217_v58 = vpop.permute.xlu2 %707 }
  0xc7   : > { %v631_v59 = vsel %vm623_vm3, %v2407_v49, %v622_v42  ;;  %v629_v60 = vsel %vm623_vm3, %v2402_v40, %v2406_v57  ;;  %v630_v62 = vsel %vm623_vm3, %v2406_v57, %v2407_v49  ;;  %v3283_v57 = vpack.i.bf16 %v3051_v37, %v3020_v26 }
  0xc8   : > { %647 = vst [vmem:[#allocation2 + $0x278] sm:$0xf] %v631_v59  ;;  %vm1493_vm3 = vcmask 687104  }
  0xc9   : > { %645 = vst [vmem:[#allocation2 + $0x158] sm:$0xf] %v629_v60  ;;  %1012 = vrot.lane.b32.xlu1 %v3112_v56, %s2902_s16 }
  0xca   : > { %646 = vst [vmem:[#allocation2 + $0x2e0] sm:$0xf] %v630_v62  ;;  %2584 = vrot.lane.b32.xlu0 %v3107_v53, %s2902_s16 }
  0xcb   : > { %2589 = vrot.lane.b32.xlu2 %v3009_v16, %s2903_s17  ;;  %v2420_v63 = vpop.permute.xlu1 %2419 }
  0xcc   : > { %v2422_v1 = vunpack.i.h.bf16 %v2420_v63  ;;  %v2421_v45 = vunpack.i.l.bf16 %v2420_v63  ;;  %v2415_v46 = vpop.permute.xlu0 %2414 }
  0xcd   : > { %v2417_v32 = vunpack.i.h.bf16 %v2415_v46  ;;  %v2416_v40 = vunpack.i.l.bf16 %v2415_v46  ;;  %v3228_v55 = vpop.permute.xlu2 %2459 }
  0xce   : > { %v671_v2 = vsel %vm666_vm4, %v2421_v45, %v2422_v1  ;;  %v672_v3 = vsel %vm666_vm4, %v2422_v1, %v2426_v11  ;;  %v2462_v4 = vunpack.i.h.bf16 %v3228_v55  ;;  %v2461_v6 = vunpack.i.l.bf16 %v3228_v55 }
  0xcf   : > { %687 = vst [vmem:[#allocation2 + $0x1a8] sm:$0xf0] %v671_v2  ;;  %v670_v8 = vsel %vm666_vm4, %v2417_v32, %v2421_v45  ;;  %v668_v9 = vsel %vm666_vm4, %v2412_v0, %v2416_v40  ;;  %v669_v13 = vsel %vm666_vm4, %v2416_v40, %v2417_v32 }
  0xd0   : > { %688 = vst [vmem:[#allocation2 + $0x158] sm:$0xf0] %v672_v3  ;;  %v757_v11 = vsel %vm752_vm6, %v2461_v6, %v2462_v4 }
  0xd1   : > { %686 = vst [vmem:[#allocation2 + $0x198] sm:$0xf0] %v670_v8  ;;  %2599 = vrot.lane.b32.xlu1 %v3031_v29, %s2903_s17  ;;  %v3313_v8 = vpack.i.bf16 %v3018_v25, %v3000_v5 }
  0xd2   : > { %684 = vst [vmem:[#allocation2 + $0x330] sm:$0xf0] %v668_v9  ;;  %2594 = vrot.lane.b32.xlu0 %v3006_v12, %s2903_s17  ;;  %v427_v9 = vld.sshfl [vmem:[#allocation1 + $0x18] sm:$0xff pattern:$0x73625140] }
  0xd3   : > { %685 = vst [vmem:[#allocation2 + $0x2d0] sm:$0xf0] %v669_v13  ;;  %2604 = vrot.lane.b32.xlu2 %v3135_v17, %s2903_s17  ;;  %v2430_v61 = vpop.permute.xlu1 %2429  ;;  %v447_v13 = vunpack.c.l.bf16 %v427_v9 }
  0xd4   : > { %773 = vst [vmem:[#allocation2 + $0xe0] sm:$0xf0] %v757_v11  ;;  %v2432_v0 = vunpack.i.h.bf16 %v2430_v61  ;;  %v2431_v15 = vunpack.i.l.bf16 %v2430_v61  ;;  %v665_v18 = vpop.permute.xlu0 %664 }
  0xd5   : > { %v674_v14 = vsel %vm666_vm4, %v2427_v10, %v665_v18  ;;  %v3255_v52 = vpop.permute.xlu2 %2469 }
  0xd6   : > { %v710_v29 = vsel %vm709_vm5, %v2431_v15, %v2432_v0  ;;  %v711_v54 = vsel %vm709_vm5, %v2432_v0, %v2436_v39  ;;  %690 = vst [vmem:[#allocation2 + $0x278] sm:$0xf0] %v674_v14  ;;  %v2472_v19 = vunpack.i.h.bf16 %v3255_v52  ;;  %v2471_v17 = vunpack.i.l.bf16 %v3255_v52 }
  0xd7   : > { %726 = vst [vmem:[#allocation2 + $0x350] sm:$0xf] %v710_v29  ;;  %v3329_v14 = vpack.i.bf16 %v447_v13, %v3086_v44  ;;  %v1257_v52 = vrot.slane %v447_v13, 4 }
  0xd8   : > { %727 = vst [vmem:[#allocation2 + $0x120] sm:$0xf] %v711_v54  ;;  %v796_v7 = vsel %vm795_vm7, %v2471_v17, %v2472_v19 }
  0xd9   : > { %812 = vst [vmem:[#allocation2 + $0xd8] sm:$0xf] %v796_v7  ;;  %2609 = vrot.lane.b32.xlu1 %v3047_v35, %s2904_s18 }
  0xda   : > { %1055 = vrot.lane.b32.xlu0 %v3100_v51, %s2903_s17  ;;  %s366_s17 = scalar_lea.vmem %s4166_s3, %s4183_s28 }
  0xdb   : > { %2614 = vrot.lane.b32.xlu2 %v3026_v27, %s2904_s18  ;;  %v2445_v10 = vpop.permute.xlu1 %2444 }
  0xdc   : > { %v2447_v20 = vunpack.i.h.bf16 %v2445_v10  ;;  %v2446_v21 = vunpack.i.l.bf16 %v2445_v10  ;;  %v2440_v23 = vpop.permute.xlu0 %2439 }
  0xdd   : > { %v2442_v28 = vunpack.i.h.bf16 %v2440_v23  ;;  %v2441_v33 = vunpack.i.l.bf16 %v2440_v23  ;;  %v3270_v39 = vpop.permute.xlu2 %2484 }
  0xde   : > { %v716_v41 = vsel %vm709_vm5, %v2446_v21, %v2447_v20  ;;  %v717_v43 = vsel %vm709_vm5, %v2447_v20, %v3217_v58  ;;  %v2487_v47 = vunpack.i.h.bf16 %v3270_v39  ;;  %v2486_v42 = vunpack.i.l.bf16 %v3270_v39 }
  0xdf   : > { %732 = vst [vmem:[#allocation2 + $0x1e8] sm:$0xf] %v716_v41  ;;  %v715_v48 = vsel %vm709_vm5, %v2442_v28, %v2446_v21  ;;  %v713_v49 = vsel %vm709_vm5, %v2437_v36, %v2441_v33  ;;  %v714_v59 = vsel %vm709_vm5, %v2441_v33, %v2442_v28  ;;  %vm1364_vm5 = vcmask 834560  }
  0xe0   : > { %733 = vst [vmem:[#allocation2 + $0x38] sm:$0xf] %v717_v43  ;;  %v802_v58 = vsel %vm795_vm7, %v2486_v42, %v2487_v47 }
  0xe1   : > { %731 = vst [vmem:[#allocation2 + $0x130] sm:$0xf] %v715_v48  ;;  %2624 = vrot.lane.b32.xlu1 %v3107_v53, %s2904_s18  ;;  %v3301_v53 = vpack.i.bf16 %v3055_v38, %v3039_v31 }
  0xe2   : > { %729 = vst [vmem:[#allocation2 + $0x260] sm:$0xf] %v713_v49  ;;  %2619 = vrot.lane.b32.xlu0 %v3045_v34, %s2904_s18 }
  0xe3   : > { %730 = vst [vmem:[#allocation2 + $0xe0] sm:$0xf] %v714_v59  ;;  %2629 = vrot.lane.b32.xlu2 %v3283_v57, %s2905_s19  ;;  %v2455_v24 = vpop.permute.xlu1 %2454  ;;  %v3357_v59 = vpack.i.bf16 %v3036_v30, %v472_v22 }
  0xe4   : > { %818 = vst [vmem:[#allocation2 + $0x320] sm:$0xf] %v802_v58  ;;  %v2457_v36 = vunpack.i.h.bf16 %v2455_v24  ;;  %v2456_v60 = vunpack.i.l.bf16 %v2455_v24  ;;  %v2450_v62 = vpop.permute.xlu0 %2449 }
  0xe5   : > { %v2452_v63 = vunpack.i.h.bf16 %v2450_v62  ;;  %v2451_v1 = vunpack.i.l.bf16 %v2450_v62  ;;  %v3297_v45 = vpop.permute.xlu2 %2494  ;;  %v3377_v62 = vpack.i.bf16 %v1257_v52, %v3097_v50 }
  0xe6   : > { %v755_v34 = vsel %vm752_vm6, %v2456_v60, %v2457_v36  ;;  %v756_v46 = vsel %vm752_vm6, %v2457_v36, %v2461_v6  ;;  %v2497_v32 = vunpack.i.h.bf16 %v3297_v45  ;;  %v2496_v40 = vunpack.i.l.bf16 %v3297_v45 }
  0xe7   : > { %771 = vst [vmem:[#allocation2 + $0x1a0] sm:$0xf0] %v755_v34  ;;  %v754_v2 = vsel %vm752_vm6, %v2452_v63, %v2456_v60  ;;  %v753_v3 = vsel %vm752_vm6, %v2451_v1, %v2452_v63 }
  0xe8   : > { %772 = vst [vmem:[#allocation2 + $0x260] sm:$0xf0] %v756_v46  ;;  %v845_v6 = vsel %vm842_vm8, %v2496_v40, %v2497_v32 }
  0xe9   : > { %770 = vst [vmem:[#allocation2 + $0x120] sm:$0xf0] %v754_v2  ;;  %2639 = vrot.lane.b32.xlu1 %v3301_v53, %s2906_s20 }
  0xea   : > { %769 = vst [vmem:[#allocation2 + $0x350] sm:$0xf0] %v753_v3  ;;  %2634 = vrot.lane.b32.xlu0 %v3283_v57, %s2907_s30 }
  0xeb   : > { %861 = vst [vmem:[#allocation2 + $0xb8] sm:$0xf0] %v845_v6  ;;  %2644 = vrot.lane.b32.xlu2 %v3313_v8, %s2905_s19  ;;  %v751_v11 = vpop.permute.xlu1 %750 }
  0xec   : > { %v2465_v61 = vpop.permute.xlu0 %2464 }
  0xed   : > { %v2467_v0 = vunpack.i.h.bf16 %v2465_v61  ;;  %v2466_v15 = vunpack.i.l.bf16 %v2465_v61  ;;  %v3326_v18 = vpop.permute.xlu2 %840 }
  0xef   : > { %v760_v29 = vsel %vm752_vm6, %v2467_v0, %v751_v11  ;;  %v758_v54 = vsel %vm752_vm6, %v2462_v4, %v2466_v15  ;;  %v759_v17 = vsel %vm752_vm6, %v2466_v15, %v2467_v0  ;;  %vm1407_vm6 = vcmask 826368  }
  0xf0   : > { %776 = vst [vmem:[#allocation2 + $0x38] sm:$0xf0] %v760_v29 }
  0xf1   : > { %774 = vst [vmem:[#allocation2 + $0x130] sm:$0xf0] %v758_v54  ;;  %2654 = vrot.lane.b32.xlu1 %v3283_v57, %s2908_s7 }
  0xf2   : > { %775 = vst [vmem:[#allocation2 + $0x1e8] sm:$0xf0] %v759_v17  ;;  %2649 = vrot.lane.b32.xlu0 %v3329_v14, %s2905_s19 }
  0xf3   : > { %2659 = vrot.lane.b32.xlu2 %v3301_v53, %s2909_s8  ;;  %v2480_v7 = vpop.permute.xlu1 %2479 }
  0xf4   : > { %v2482_v55 = vunpack.i.h.bf16 %v2480_v7  ;;  %v2481_v10 = vunpack.i.l.bf16 %v2480_v7  ;;  %v2475_v4 = vpop.permute.xlu0 %2474 }
  0xf5   : > { %v2477_v20 = vunpack.i.h.bf16 %v2475_v4  ;;  %v2476_v21 = vunpack.i.l.bf16 %v2475_v4  ;;  %v3342_v23 = vpop.permute.xlu2 %2519 }
  0xf6   : > { %v800_v28 = vsel %vm795_vm7, %v2481_v10, %v2482_v55  ;;  %v801_v33 = vsel %vm795_vm7, %v2482_v55, %v2486_v42  ;;  %v2522_v41 = vunpack.i.h.bf16 %v3342_v23  ;;  %v2521_v43 = vunpack.i.l.bf16 %v3342_v23 }
  0xf7   : > { %816 = vst [vmem:[#allocation2 + $0x98] sm:$0xf] %v800_v28  ;;  %v799_v48 = vsel %vm795_vm7, %v2477_v20, %v2481_v10  ;;  %v797_v49 = vsel %vm795_vm7, %v2472_v19, %v2476_v21  ;;  %v798_v58 = vsel %vm795_vm7, %v2476_v21, %v2477_v20 }
  0xf8   : > { %817 = vst [vmem:[#allocation2 + $0xa0] sm:$0xf] %v801_v33  ;;  %v890_v42 = vsel %vm885_vm9, %v2521_v43, %v2522_v41 }
  0xf9   : > { %815 = vst [vmem:[#allocation2 + $0x170] sm:$0xf] %v799_v48  ;;  %2669 = vrot.lane.b32.xlu1 %v3329_v14, %s2907_s30 }
  0xfa   : > { %813 = vst [vmem:[#allocation2 + $0x298] sm:$0xf] %v797_v49  ;;  %2664 = vrot.lane.b32.xlu0 %v3313_v8, %s2907_s30 }
  0xfb   : > { %814 = vst [vmem:[#allocation2 + $0xb8] sm:$0xf] %v798_v58  ;;  %2674 = vrot.lane.b32.xlu2 %v3357_v59, %s2906_s20  ;;  %v2490_v5 = vpop.permute.xlu1 %2489 }
  0xfc   : > { %906 = vst [vmem:[#allocation2 + $0x248] sm:$0xf] %v890_v42  ;;  %v2492_v22 = vunpack.i.h.bf16 %v2490_v5  ;;  %v2491_v19 = vunpack.i.l.bf16 %v2490_v5  ;;  %v794_v24 = vpop.permute.xlu0 %793 }
  0xfd   : > { %v803_v36 = vsel %vm795_vm7, %v2487_v47, %v794_v24  ;;  %v3374_v60 = vpop.permute.xlu2 %2529  ;;  %v3440_v24 = vld.sshfl [vmem:[#allocation1 + $0x20] sm:$0xff pattern:$0x73625140]  ;;  %vm1278_vm7 = vcmask 973824  }
  0xfe   : > { %v843_v63 = vsel %vm842_vm8, %v2491_v19, %v2492_v22  ;;  %v844_v1 = vsel %vm842_vm8, %v2492_v22, %v2496_v40  ;;  %819 = vst [vmem:[#allocation2 + $0xf0] sm:$0xf] %v803_v36  ;;  %v2532_v34 = vunpack.i.h.bf16 %v3374_v60  ;;  %v2531_v46 = vunpack.i.l.bf16 %v3374_v60 }
  0xff   : > { %859 = vst [vmem:[#allocation2 + $0xd8] sm:$0xf0] %v843_v63 }
 0x100   : > { %860 = vst [vmem:[#allocation2 + $0x298] sm:$0xf0] %v844_v1  ;;  %v929_v39 = vsel %vm928_vm10, %v2531_v46, %v2532_v34 }
 0x101   : > { %945 = vst [vmem:[#allocation2 + $0x1f8] sm:$0xf0] %v929_v39  ;;  %2684 = vrot.lane.b32.xlu1 %v3283_v57, %s2910_s9 }
 0x102   : > { %2679 = vrot.lane.b32.xlu0 %v3377_v62, %s2906_s20 }
 0x103   : > { %2689 = vrot.lane.b32.xlu2 %v3301_v53, %s2911_s10  ;;  %v2505_v47 = vpop.permute.xlu1 %2504 }
 0x104   : > { %v2507_v40 = vunpack.i.h.bf16 %v2505_v47  ;;  %v2506_v2 = vunpack.i.l.bf16 %v2505_v47  ;;  %v2500_v3 = vpop.permute.xlu0 %2499 }
 0x105   : > { %v2502_v9 = vunpack.i.h.bf16 %v2500_v3  ;;  %v2501_v6 = vunpack.i.l.bf16 %v2500_v3  ;;  %v3394_v13 = vpop.permute.xlu2 %2544 }
 0x106   : > { %v849_v11 = vsel %vm842_vm8, %v2506_v2, %v2507_v40  ;;  %v850_v61 = vsel %vm842_vm8, %v2507_v40, %v3326_v18  ;;  %v2547_v0 = vunpack.i.h.bf16 %v3394_v13  ;;  %v2546_v15 = vunpack.i.l.bf16 %v3394_v13 }
 0x107   : > { %865 = vst [vmem:[#allocation2 + $0x320] sm:$0xf0] %v849_v11  ;;  %v848_v29 = vsel %vm842_vm8, %v2502_v9, %v2506_v2  ;;  %v846_v54 = vsel %vm842_vm8, %v2497_v32, %v2501_v6  ;;  %v847_v17 = vsel %vm842_vm8, %v2501_v6, %v2502_v9  ;;  %vm1321_vm8 = vcmask 965632  }
 0x108   : > { %866 = vst [vmem:[#allocation2 + $0xf0] sm:$0xf0] %v850_v61  ;;  %v935_v18 = vsel %vm928_vm10, %v2546_v15, %v2547_v0 }
 0x109   : > { %864 = vst [vmem:[#allocation2 + $0xa0] sm:$0xf0] %v848_v29  ;;  %2699 = vrot.lane.b32.xlu1 %v3329_v14, %s2908_s7 }
 0x10a   : > { %862 = vst [vmem:[#allocation2 + $0x170] sm:$0xf0] %v846_v54  ;;  %2694 = vrot.lane.b32.xlu0 %v3313_v8, %s2908_s7 }
 0x10b   : > { %863 = vst [vmem:[#allocation2 + $0x98] sm:$0xf0] %v847_v17  ;;  %2704 = vrot.lane.b32.xlu2 %v3357_v59, %s2909_s8  ;;  %v2515_v45 = vpop.permute.xlu1 %2514 }
 0x10c   : > { %951 = vst [vmem:[#allocation2 + $0x2a8] sm:$0xf0] %v935_v18  ;;  %v2517_v32 = vunpack.i.h.bf16 %v2515_v45  ;;  %v2516_v7 = vunpack.i.l.bf16 %v2515_v45  ;;  %v2510_v55 = vpop.permute.xlu0 %2509 }
 0x10d   : > { %v2512_v10 = vunpack.i.h.bf16 %v2510_v55  ;;  %v2511_v4 = vunpack.i.l.bf16 %v2510_v55  ;;  %v3417_v20 = vpop.permute.xlu2 %2554 }
 0x10e   : > { %v888_v21 = vsel %vm885_vm9, %v2516_v7, %v2517_v32  ;;  %v889_v28 = vsel %vm885_vm9, %v2517_v32, %v2521_v43  ;;  %v2557_v33 = vunpack.i.h.bf16 %v3417_v20  ;;  %v2556_v48 = vunpack.i.l.bf16 %v3417_v20  ;;  %v429_v20 = vld.sshfl [vmem:[#allocation1 + $0x28] sm:$0xff pattern:$0x73625140] }
 0x10f   : > { %904 = vst [vmem:[#allocation2 + $0x358] sm:$0xf] %v888_v21  ;;  %v887_v49 = vsel %vm885_vm9, %v2512_v10, %v2516_v7  ;;  %v886_v58 = vsel %vm885_vm9, %v2511_v4, %v2512_v10 }
 0x110   : > { %905 = vst [vmem:[#allocation2 + $0x1c0] sm:$0xf] %v889_v28  ;;  %v974_v42 = vsel %vm971_vm11, %v2556_v48, %v2557_v33 }
 0x111   : > { %903 = vst [vmem:[#allocation2 + $0x2f0] sm:$0xf] %v887_v49  ;;  %2714 = vrot.lane.b32.xlu1 %v3283_v57, %s2912_s11 }
 0x112   : > { %902 = vst [vmem:[#allocation2 + $0x1f8] sm:$0xf] %v886_v58  ;;  %2709 = vrot.lane.b32.xlu0 %v3377_v62, %s2909_s8 }
 0x113   : > { %990 = vst [vmem:[#allocation2 + $0x178] sm:$0xf] %v974_v42  ;;  %2719 = vrot.lane.b32.xlu2 %v3301_v53, %s2913_s12  ;;  %v884_v43 = vpop.permute.xlu1 %883  ;;  %v448_v53 = vunpack.c.l.bf16 %v3440_v24  ;;  %v3530_v24 = vunpack.c.l.bf16 %v429_v20 }
 0x114   : > { %v2525_v52 = vpop.permute.xlu0 %2524 }
 0x115   : > { %v2527_v5 = vunpack.i.h.bf16 %v2525_v52  ;;  %v2526_v22 = vunpack.i.l.bf16 %v2525_v52  ;;  %v3438_v19 = vpop.permute.xlu2 %969  ;;  %v3459_v2 = vpack.i.bf16 %v3100_v51, %v448_v53 }
 0x117   : > { %v893_v36 = vsel %vm885_vm9, %v2527_v5, %v884_v43  ;;  %v891_v57 = vsel %vm885_vm9, %v2522_v41, %v2526_v22  ;;  %v892_v63 = vsel %vm885_vm9, %v2526_v22, %v2527_v5  ;;  %vm1143_vm9 = vcmask 187392  }
 0x118   : > { %909 = vst [vmem:[#allocation2 + $0x310] sm:$0xf] %v893_v36 }
 0x119   : > { %907 = vst [vmem:[#allocation2 + $0x340] sm:$0xf] %v891_v57  ;;  %2729 = vrot.lane.b32.xlu1 %v3329_v14, %s2910_s9 }
 0x11a   : > { %908 = vst [vmem:[#allocation2 + $0x2a8] sm:$0xf] %v892_v63  ;;  %2724 = vrot.lane.b32.xlu0 %v3313_v8, %s2910_s9 }
 0x11b   : > { %2734 = vrot.lane.b32.xlu2 %v3357_v59, %s2911_s10  ;;  %v2540_v1 = vpop.permute.xlu1 %2539 }
 0x11c   : > { %v2542_v23 = vunpack.i.h.bf16 %v2540_v1  ;;  %v2541_v46 = vunpack.i.l.bf16 %v2540_v1  ;;  %v2535_v41 = vpop.permute.xlu0 %2534 }
 0x11d   : > { %v2537_v39 = vunpack.i.h.bf16 %v2535_v41  ;;  %v2536_v47 = vunpack.i.l.bf16 %v2535_v41  ;;  %v3454_v40 = vpop.permute.xlu2 %2579 }
 0x11e   : > { %v933_v3 = vsel %vm928_vm10, %v2541_v46, %v2542_v23  ;;  %v934_v9 = vsel %vm928_vm10, %v2542_v23, %v2546_v15  ;;  %v2582_v6 = vunpack.i.h.bf16 %v3454_v40  ;;  %v2581_v11 = vunpack.i.l.bf16 %v3454_v40 }
 0x11f   : > { %949 = vst [vmem:[#allocation2 + $0x248] sm:$0xf0] %v933_v3  ;;  %v932_v61 = vsel %vm928_vm10, %v2537_v39, %v2541_v46  ;;  %v930_v29 = vsel %vm928_vm10, %v2532_v34, %v2536_v47  ;;  %v931_v54 = vsel %vm928_vm10, %v2536_v47, %v2537_v39 }
 0x120   : > { %950 = vst [vmem:[#allocation2 + $0x340] sm:$0xf0] %v934_v9  ;;  %v1019_v15 = vsel %vm1014_vm12, %v2581_v11, %v2582_v6 }
 0x121   : > { %948 = vst [vmem:[#allocation2 + $0x1c0] sm:$0xf0] %v932_v61  ;;  %2744 = vrot.lane.b32.xlu1 %v3459_v2, %s2905_s19 }
 0x122   : > { %946 = vst [vmem:[#allocation2 + $0x2f0] sm:$0xf0] %v930_v29  ;;  %2739 = vrot.lane.b32.xlu0 %v3377_v62, %s2911_s10 }
 0x123   : > { %947 = vst [vmem:[#allocation2 + $0x358] sm:$0xf0] %v931_v54  ;;  %2749 = vrot.lane.b32.xlu2 %v3006_v12, %s2914_s13  ;;  %v2550_v60 = vpop.permute.xlu1 %2549 }
 0x124   : > { %1035 = vst [vmem:[#allocation2 + $0x2e8] sm:$0xf0] %v1019_v15  ;;  %v2552_v34 = vunpack.i.h.bf16 %v2550_v60  ;;  %v2551_v17 = vunpack.i.l.bf16 %v2550_v60  ;;  %v927_v18 = vpop.permute.xlu0 %926 }
 0x125   : > { %v936_v45 = vsel %vm928_vm10, %v2547_v0, %v927_v18  ;;  %v3486_v32 = vpop.permute.xlu2 %2589  ;;  %vm1232_vm10 = vcmask 982016  }
 0x126   : > { %v972_v7 = vsel %vm971_vm11, %v2551_v17, %v2552_v34  ;;  %v973_v55 = vsel %vm971_vm11, %v2552_v34, %v2556_v48  ;;  %952 = vst [vmem:[#allocation2 + $0x310] sm:$0xf0] %v936_v45  ;;  %v2592_v12 = vunpack.i.h.bf16 %v3486_v32  ;;  %v2591_v10 = vunpack.i.l.bf16 %v3486_v32 }
 0x127   : > { %988 = vst [vmem:[#allocation2 + $0x2b8] sm:$0xf] %v972_v7  ;;  %v2793_v17 = vpack.i.bf16 %v3051_v37, %v3018_v25  ;;  %v2803_v7 = vpack.i.bf16 %v3055_v38, %v3036_v30 }
 0x128   : > { %989 = vst [vmem:[#allocation2 + $0x228] sm:$0xf] %v973_v55  ;;  %v1058_v13 = vsel %vm1057_vm13, %v2591_v10, %v2592_v12 }
 0x129   : > { %1074 = vst [vmem:[#allocation2 + $0x270] sm:$0xf] %v1058_v13  ;;  %2759 = vrot.lane.b32.xlu1 %v3313_v8, %s2912_s11 }
 0x12a   : > { %2754 = vrot.lane.b32.xlu0 %v3026_v27, %s2915_s14 }
 0x12b   : > { %2764 = vrot.lane.b32.xlu2 %v3329_v14, %s2912_s11  ;;  %v2565_v0 = vpop.permute.xlu1 %2564 }
 0x12c   : > { %v2567_v4 = vunpack.i.h.bf16 %v2565_v0  ;;  %v2566_v21 = vunpack.i.l.bf16 %v2565_v0  ;;  %v2560_v28 = vpop.permute.xlu0 %2559 }
 0x12d   : > { %v2562_v48 = vunpack.i.h.bf16 %v2560_v28  ;;  %v2561_v49 = vunpack.i.l.bf16 %v2560_v28  ;;  %v3503_v58 = vpop.permute.xlu2 %2604 }
 0x12e   : > { %v978_v42 = vsel %vm971_vm11, %v2566_v21, %v2567_v4  ;;  %v979_v8 = vsel %vm971_vm11, %v2567_v4, %v3438_v19  ;;  %v2607_v43 = vunpack.i.h.bf16 %v3503_v58  ;;  %v2606_v27 = vunpack.i.l.bf16 %v3503_v58 }
 0x12f   : > { %994 = vst [vmem:[#allocation2 + $0x2f8] sm:$0xf] %v978_v42  ;;  %v977_v14 = vsel %vm971_vm11, %v2562_v48, %v2566_v21  ;;  %v975_v52 = vsel %vm971_vm11, %v2557_v33, %v2561_v49  ;;  %v976_v5 = vsel %vm971_vm11, %v2561_v49, %v2562_v48  ;;  %v1258_v19 = vrot.slane %v448_v53, 4 }
 0x130   : > { %995 = vst [vmem:[#allocation2 + $0x268] sm:$0xf] %v979_v8  ;;  %v1064_v22 = vsel %vm1057_vm13, %v2606_v27, %v2607_v43  ;;  %vm1186_vm11 = vcmask 179200  }
 0x131   : > { %993 = vst [vmem:[#allocation2 + $0x208] sm:$0xf] %v977_v14  ;;  %2774 = vrot.lane.b32.xlu1 %v3377_v62, %s2913_s12  ;;  %v3533_v53 = vpack.i.bf16 %v3112_v56, %v1258_v19 }
 0x132   : > { %991 = vst [vmem:[#allocation2 + $0x200] sm:$0xf] %v975_v52  ;;  %2769 = vrot.lane.b32.xlu0 %v3357_v59, %s2913_s12 }
 0x133   : > { %992 = vst [vmem:[#allocation2 + $0x2e8] sm:$0xf] %v976_v5  ;;  %2779 = vrot.lane.b32.xlu2 %v3459_v2, %s2907_s30  ;;  %v2575_v33 = vpop.permute.xlu1 %2574 }
 0x134   : > { %1080 = vst [vmem:[#allocation2 + $0xe8] sm:$0xf] %v1064_v22  ;;  %v2577_v36 = vunpack.i.h.bf16 %v2575_v33  ;;  %v2576_v57 = vunpack.i.l.bf16 %v2575_v33  ;;  %v2570_v63 = vpop.permute.xlu0 %2569  ;;  %v3598_v22 = vrot.slane %v3530_v24, 4 }
 0x135   : > { %v2572_v1 = vunpack.i.h.bf16 %v2570_v63  ;;  %v2571_v62 = vunpack.i.l.bf16 %v2570_v63  ;;  %v3528_v23 = vpop.permute.xlu2 %2614 }
 0x136   : > { %v1017_v59 = vsel %vm1014_vm12, %v2576_v57, %v2577_v36  ;;  %v1018_v46 = vsel %vm1014_vm12, %v2577_v36, %v2581_v11  ;;  %v2617_v41 = vunpack.i.h.bf16 %v3528_v23  ;;  %v2616_v39 = vunpack.i.l.bf16 %v3528_v23 }
 0x137   : > { %1033 = vst [vmem:[#allocation2 + $0x178] sm:$0xf0] %v1017_v59  ;;  %v1016_v47 = vsel %vm1014_vm12, %v2572_v1, %v2576_v57  ;;  %v1015_v3 = vsel %vm1014_vm12, %v2571_v62, %v2572_v1 }
 0x138   : > { %1034 = vst [vmem:[#allocation2 + $0x200] sm:$0xf0] %v1018_v46  ;;  %v1103_v9 = vsel %vm1100_vm14, %v2616_v39, %v2617_v41 }
 0x139   : > { %1032 = vst [vmem:[#allocation2 + $0x228] sm:$0xf0] %v1016_v47  ;;  %1577 = vrot.lane.b32.xlu1 %v3530_v24, %s2905_s19 }
 0x13a   : > { %1031 = vst [vmem:[#allocation2 + $0x2b8] sm:$0xf0] %v1015_v3  ;;  %2784 = vrot.lane.b32.xlu0 %v3533_v53, %s2906_s20 }
 0x13b   : > { %1119 = vst [vmem:[#allocation2 + $0x1c8] sm:$0xf0] %v1103_v9  ;;  %2789 = vrot.lane.b32.xlu2 %v3009_v16, %s2914_s13  ;;  %v1013_v11 = vpop.permute.xlu1 %1012 }
 0x13c   : > { %v2585_v61 = vpop.permute.xlu0 %2584 }
 0x13d   : > { %v2587_v29 = vunpack.i.h.bf16 %v2585_v61  ;;  %v2586_v54 = vunpack.i.l.bf16 %v2585_v61  ;;  %v3554_v15 = vpop.permute.xlu2 %2629 }
 0x13e   : > { %v2632_v60 = vunpack.i.h.bf16 %v3554_v15  ;;  %v2631_v34 = vunpack.i.l.bf16 %v3554_v15 }
 0x13f   : > { %v1022_v18 = vsel %vm1014_vm12, %v2587_v29, %v1013_v11  ;;  %v1020_v16 = vsel %vm1014_vm12, %v2582_v6, %v2586_v54  ;;  %v1021_v45 = vsel %vm1014_vm12, %v2586_v54, %v2587_v29  ;;  %vm1932_vm12 = vcmask 1040384  }
 0x140   : > { %1038 = vst [vmem:[#allocation2 + $0x268] sm:$0xf0] %v1022_v18  ;;  %v1582_v55 = vsel %vm1579_vm15, %v2631_v34, %v2632_v60 }
 0x141   : > { %1036 = vst [vmem:[#allocation2 + $0x208] sm:$0xf0] %v1020_v16  ;;  %2799 = vrot.lane.b32.xlu1 %v3047_v35, %s2915_s14 }
 0x142   : > { %1037 = vst [vmem:[#allocation2 + $0x2f8] sm:$0xf0] %v1021_v45  ;;  %2794 = vrot.lane.b32.xlu0 %v2793_v17, %s2914_s13 }
 0x143   : > { %1598 = vst [vmem:[#allocation2 + $0x8] sm:$0xf] %v1582_v55  ;;  %2804 = vrot.lane.b32.xlu2 %v2803_v7, %s2915_s14  ;;  %v2600_v25 = vpop.permute.xlu1 %2599 }
 0x144   : > { %v2602_v37 = vunpack.i.h.bf16 %v2600_v25  ;;  %v2601_v40 = vunpack.i.l.bf16 %v2600_v25  ;;  %v2595_v6 = vpop.permute.xlu0 %2594 }
 0x145   : > { %v2597_v30 = vunpack.i.h.bf16 %v2595_v6  ;;  %v2596_v38 = vunpack.i.l.bf16 %v2595_v6  ;;  %v2645_v10 = vpop.permute.xlu2 %2644 }
 0x146   : > { %v1062_v13 = vsel %vm1057_vm13, %v2601_v40, %v2602_v37  ;;  %v1063_v0 = vsel %vm1057_vm13, %v2602_v37, %v2606_v27  ;;  %v2647_v35 = vunpack.i.h.bf16 %v2645_v10  ;;  %v2646_v4 = vunpack.i.l.bf16 %v2645_v10 }
 0x147   : > { %1078 = vst [vmem:[#allocation2 + $0x138] sm:$0xf] %v1062_v13  ;;  %v1061_v21 = vsel %vm1057_vm13, %v2597_v30, %v2601_v40  ;;  %v1059_v28 = vsel %vm1057_vm13, %v2592_v12, %v2596_v38  ;;  %v1060_v48 = vsel %vm1057_vm13, %v2596_v38, %v2597_v30 }
 0x148   : > { %1079 = vst [vmem:[#allocation2 + $0x2c0] sm:$0xf] %v1063_v0  ;;  %v1580_v49 = vsel %vm1579_vm15, %v2646_v4, %v2647_v35  ;;  %v1581_v42 = vsel %vm1579_vm15, %v2647_v35, %v2631_v34  ;;  %v2843_v4 = vpack.i.bf16 %v3039_v31, %v3097_v50 }
 0x149   : > { %1077 = vst [vmem:[#allocation2 + $0xb0] sm:$0xf] %v1061_v21  ;;  %2814 = vrot.lane.b32.xlu1 %v3533_v53, %s2909_s8 }
 0x14a   : > { %1075 = vst [vmem:[#allocation2 + $0xf8] sm:$0xf] %v1059_v28  ;;  %2809 = vrot.lane.b32.xlu0 %v3459_v2, %s2908_s7  ;;  %v1712_v8 = vld [vmem:[#allocation2 + $0x8] sm:$0xf] }
 0x14b   : > { %1076 = vst [vmem:[#allocation2 + $0x1c8] sm:$0xf] %v1060_v48  ;;  %1491 = vrot.lane.b32.xlu2 %v3530_v24, %s2907_s30  ;;  %v2610_v32 = vpop.permute.xlu1 %2609  ;;  %2240 = vmatpush.msk.msra.mxu2 %vm1721_vm0, %v1712_v8  ;;  %v2838_v48 = vpack.i.bf16 %v3020_v26, %v3086_v44 }
 0x14c   : > { %1596 = vst [vmem:[#allocation2 + $0x190] sm:$0xf] %v1580_v49  ;;  %v2612_v12 = vunpack.i.h.bf16 %v2610_v32  ;;  %v2611_v27 = vunpack.i.l.bf16 %v2610_v32  ;;  %v1056_v14 = vpop.permute.xlu0 %1055 }
 0x14d   : > { %1597 = vst [vmem:[#allocation2 + $0x220] sm:$0xf] %v1581_v42  ;;  %v1065_v52 = vsel %vm1057_vm13, %v2607_v43, %v1056_v14  ;;  %v3595_v5 = vpop.permute.xlu2 %2659 }
 0x14e   : > { %v1101_v19 = vsel %vm1100_vm14, %v2611_v27, %v2612_v12  ;;  %v1102_v20 = vsel %vm1100_vm14, %v2612_v12, %v2616_v39  ;;  %1081 = vst [vmem:[#allocation2 + $0x1d8] sm:$0xf] %v1065_v52  ;;  %v2662_v33 = vunpack.i.h.bf16 %v3595_v5  ;;  %v2661_v36 = vunpack.i.l.bf16 %v3595_v5 }
 0x14f   : > { %1117 = vst [vmem:[#allocation2 + $0x270] sm:$0xf0] %v1101_v19 }
 0x150   : > { %1118 = vst [vmem:[#allocation2 + $0xf8] sm:$0xf0] %v1102_v20  ;;  %v1453_v58 = vsel %vm1450_vm1, %v2661_v36, %v2662_v33 }
 0x151   : > { %1469 = vst [vmem:[#allocation2 + $0x288] sm:$0xf0] %v1453_v58  ;;  %2819 = vrot.lane.b32.xlu1 %v3459_v2, %s2910_s9 }
 0x152   : > { %1534 = vrot.lane.b32.xlu0 %v3598_v22, %s2906_s20  ;;  %s2256_s20 = smul.u32 24, %s2992_s29  ;;  %s2916_s29 = smov 1.0  }
 0x153   : > { %2824 = vrot.lane.b32.xlu2 %v3533_v53, %s2911_s10  ;;  %v3617_v43 = vpop.permute.xlu1 %2624  ;;  %v1710_v57 = vld [vmem:[#allocation2 + $0x190] sm:$0xf] }
 0x154   : > { %v2627_v63 = vunpack.i.h.bf16 %v3617_v43  ;;  %v2626_v1 = vunpack.i.l.bf16 %v3617_v43  ;;  %v2620_v62 = vpop.permute.xlu0 %2619  ;;  %v1711_v59 = vld [vmem:[#allocation2 + $0x220] sm:$0xf]  ;;  %2236 = vmatpush.msk.msra.mxu0 %vm1721_vm0, %v1710_v57  ;;  %s374_s30 = sadd.s32 %s2256_s20, %s4183_s28 }
 0x155   : > { %v2622_v46 = vunpack.i.h.bf16 %v2620_v62  ;;  %v2621_v39 = vunpack.i.l.bf16 %v2620_v62  ;;  %v2675_v47 = vpop.permute.xlu2 %2674  ;;  %2238 = vmatpush.msk.msra.mxu1 %vm1721_vm0, %v1711_v59  ;;  %v1643_v43 = vld [vmem:[#allocation2 + $0xa0] sm:$0xff] }
 0x156   : > { %v1107_v3 = vsel %vm1100_vm14, %v2626_v1, %v2627_v63  ;;  %v2677_v9 = vunpack.i.h.bf16 %v2675_v47  ;;  %v2676_v11 = vunpack.i.l.bf16 %v2675_v47 }
 0x157   : > { %1123 = vst [vmem:[#allocation2 + $0xe8] sm:$0xf0] %v1107_v3  ;;  %v1106_v61 = vsel %vm1100_vm14, %v2622_v46, %v2626_v1  ;;  %v1104_v29 = vsel %vm1100_vm14, %v2617_v41, %v2621_v39  ;;  %v1105_v54 = vsel %vm1100_vm14, %v2621_v39, %v2622_v46 }
 0x158   : > { %1122 = vst [vmem:[#allocation2 + $0x2c0] sm:$0xf0] %v1106_v61  ;;  %v1537_v34 = vsel %vm1536_vm2, %v2676_v11, %v2677_v9 }
 0x159   : > { %1120 = vst [vmem:[#allocation2 + $0xb0] sm:$0xf0] %v1104_v29  ;;  %1448 = vrot.lane.b32.xlu1 %v3598_v22, %s2909_s8 }
 0x15a   : > { %1121 = vst [vmem:[#allocation2 + $0x138] sm:$0xf0] %v1105_v54  ;;  %1405 = vrot.lane.b32.xlu0 %v3530_v24, %s2908_s7  ;;  %s2233_s7 = sshll.u32 %s374_s30, 2 }
 0x15b   : > { %1553 = vst [vmem:[#allocation2 + $0x240] sm:$0xf0] %v1537_v34  ;;  %2829 = vrot.lane.b32.xlu2 %v3459_v2, %s2912_s11  ;;  %v3638_v23 = vpop.permute.xlu1 %2639 }
 0x15c   : > { %v2642_v41 = vunpack.i.h.bf16 %v3638_v23  ;;  %v2641_v17 = vunpack.i.l.bf16 %v3638_v23  ;;  %v2635_v18 = vpop.permute.xlu0 %2634 }
 0x15d   : > { %v2637_v16 = vunpack.i.h.bf16 %v2635_v18  ;;  %v2636_v45 = vunpack.i.l.bf16 %v2635_v18  ;;  %v3642_v7 = vpop.permute.xlu2 %2689 }
 0x15e   : > { %v1538_v55 = vsel %vm1536_vm2, %v2677_v9, %v2641_v17  ;;  %v1539_v25 = vsel %vm1536_vm2, %v2641_v17, %v2642_v41  ;;  %v2692_v2 = vunpack.i.h.bf16 %v3642_v7  ;;  %v2691_v37 = vunpack.i.l.bf16 %v3642_v7 }
 0x15f   : > { %1554 = vst [vmem:[#allocation2 + $0x258] sm:$0xf0] %v1538_v55  ;;  %v1496_v40 = vsel %vm1493_vm3, %v2636_v45, %v2637_v16 }
 0x160   : > { %1555 = vst [vmem:[#allocation2 + $0x1b8] sm:$0xf0] %v1539_v25  ;;  %v1367_v6 = vsel %vm1364_vm5, %v2691_v37, %v2692_v2 }
 0x161   : > { %1512 = vst [vmem:[#allocation2 + $0x1b8] sm:$0xf] %v1496_v40  ;;  %1319 = vrot.lane.b32.xlu1 %v3530_v24, %s2910_s9 }
 0x162   : > { %1383 = vst [vmem:[#allocation2 + $0x68] sm:$0xf0] %v1367_v6  ;;  %2834 = vrot.lane.b32.xlu0 %v3533_v53, %s2913_s12 }
 0x163   : > { %v3660_v30 = vpop.permute.xlu1 %2654  ;;  %1362 = vrot.lane.b32.xlu2 %v3598_v22, %s2911_s10  ;;  %s376_s10 = scalar_lea.vmem %s4167_s4, %s2233_s7 }
 0x164   : > { %v2657_v38 = vunpack.i.h.bf16 %v3660_v30  ;;  %v2656_v10 = vunpack.i.l.bf16 %v3660_v30  ;;  %v3666_v13 = vpop.permute.xlu0 %2649 }
 0x165   : > { %v2651_v0 = vunpack.i.l.bf16 %v3666_v13  ;;  %v2705_v35 = vpop.permute.xlu2 %2704 }
 0x166   : > { %v1410_v53 = vsel %vm1407_vm6, %v2656_v10, %v2657_v38  ;;  %v2707_v21 = vunpack.i.h.bf16 %v2705_v35  ;;  %v2706_v28 = vunpack.i.l.bf16 %v2705_v35 }
 0x167   : > { %1426 = vst [vmem:[#allocation2 + $0x288] sm:$0xf] %v1410_v53  ;;  %v1583_v49 = vsel %vm1579_vm15, %v2632_v60, %v2651_v0 }
 0x168   : > { %1599 = vst [vmem:[#allocation2 + $0x18] sm:$0xf] %v1583_v49  ;;  %v1451_v31 = vsel %vm1450_vm1, %v2706_v28, %v2707_v21  ;;  %v1452_v50 = vsel %vm1450_vm1, %v2707_v21, %v2661_v36  ;;  %v1704_v42 = vld [vmem:[#allocation2 + $0x1b8] sm:$0xff] }
 0x169   : > { %1467 = vst [vmem:[#allocation2 + $0x348] sm:$0xf0] %v1451_v31  ;;  %1789 = vmatpush.msra.mxu2 %v1704_v42  ;;  %2844 = vrot.lane.b32.xlu1 %v2843_v4, %s2915_s14 }
 0x16a   : > { %1468 = vst [vmem:[#allocation2 + $0x168] sm:$0xf0] %v1452_v50  ;;  %2839 = vrot.lane.b32.xlu0 %v2838_v48, %s2914_s13 }
 0x16b   : > { %v3689_v26 = vpop.permute.xlu1 %2669  ;;  %1230 = vrot.lane.b32.xlu2 %v3530_v24, %s2912_s11 }
 0x16c   : > { %v2671_v44 = vunpack.i.l.bf16 %v3689_v26  ;;  %v2665_v15 = vpop.permute.xlu0 %2664 }
 0x16d   : > { %v2667_v60 = vunpack.i.h.bf16 %v2665_v15  ;;  %v2666_v8 = vunpack.i.l.bf16 %v2665_v15  ;;  %v3694_v32 = vpop.permute.xlu2 %2719 }
 0x16e   : > { %v1497_v12 = vsel %vm1493_vm3, %v2637_v16, %v2671_v44  ;;  %v2722_v27 = vunpack.i.h.bf16 %v3694_v32  ;;  %v2721_v14 = vunpack.i.l.bf16 %v3694_v32  ;;  %v1696_v52 = vld [vmem:[#allocation2 + $0x288] sm:$0xff] }
 0x16f   : > { %1513 = vst [vmem:[#allocation2 + $0x118] sm:$0xf] %v1497_v12  ;;  %v1494_v24 = vsel %vm1493_vm3, %v2666_v8, %v2667_v60  ;;  %v1495_v19 = vsel %vm1493_vm3, %v2667_v60, %v2636_v45  ;;  %v1713_v20 = vld [vmem:[#allocation2 + $0x18] sm:$0xf]  ;;  %1790 = vmatpush.msra.mxu2 %v1696_v52 }
 0x170   : > { %1510 = vst [vmem:[#allocation2 + $0x240] sm:$0xf] %v1494_v24  ;;  %v1281_v36 = vsel %vm1278_vm7, %v2721_v14, %v2722_v27  ;;  %2242 = vmatpush.msk.msra.mxu3 %vm1721_vm0, %v1713_v20 }
 0x171   : > { %1511 = vst [vmem:[#allocation2 + $0x258] sm:$0xf] %v1495_v19  ;;  %1141 = vrot.lane.b32.xlu1 %v3100_v51, %s2914_s13 }
 0x172   : > { %1297 = vst [vmem:[#allocation2 + $0x1e0] sm:$0xf0] %v1281_v36  ;;  %1276 = vrot.lane.b32.xlu0 %v3598_v22, %s2913_s12  ;;  %s378_s12 = smul.u32 3, %s2876_s22 }
 0x173   : > { %v3713_v58 = vpop.permute.xlu1 %2684  ;;  %1184 = vrot.lane.b32.xlu2 %v3112_v56, %s2915_s14 }
 0x174   : > { %v2687_v57 = vunpack.i.h.bf16 %v3713_v58  ;;  %v2686_v1 = vunpack.i.l.bf16 %v3713_v58  ;;  %v3719_v62 = vpop.permute.xlu0 %2679  ;;  %s379_s13 = sadd.s32 %s2872_s21, %s378_s12 }
 0x175   : > { %v2681_v59 = vunpack.i.l.bf16 %v3719_v62  ;;  %v2735_v46 = vpop.permute.xlu2 %2734  ;;  %v2682_v32 = vunpack.i.h.bf16 %v3719_v62  ;;  %p380_p9 = scmp.lt.s32.totalorder %s379_s13, 5 }
 0x176   : > { %v1324_v51 = vsel %vm1321_vm8, %v2686_v1, %v2687_v57  ;;  %v2737_v22 = vunpack.i.h.bf16 %v2735_v46  ;;  %v2736_v39 = vunpack.i.l.bf16 %v2735_v46 }
 0x177   : > { %1340 = vst [vmem:[#allocation2 + $0x68] sm:$0xf] %v1324_v51  ;;  %v1540_v47 = vsel %vm1536_vm2, %v2642_v41, %v2681_v59  ;;  %v1702_v3 = vld [vmem:[#allocation2 + $0x240] sm:$0xff]  ;;  %s4185_s13 = smov (!%p380_p9, %s379_s13), 5 }
 0x178   : > { %1556 = vst [vmem:[#allocation2 + $0x118] sm:$0xf0] %v1540_v47  ;;  %v1365_v9 = vsel %vm1364_vm5, %v2736_v39, %v2737_v22  ;;  %v1366_v11 = vsel %vm1364_vm5, %v2737_v22, %v2691_v37  ;;  %1749 = vmatpush.msra.mxu0 %v1702_v3  ;;  %v1703_v61 = vld [vmem:[#allocation2 + $0x258] sm:$0xff]  ;;  %s2234_s14 = sshll.u32 %s4185_s13, 3 }
 0x179   : > { %1381 = vst [vmem:[#allocation2 + $0x140] sm:$0xf0] %v1365_v9  ;;  %1769 = vmatpush.msra.mxu1 %v1703_v61  ;;  %s391_s19 = scalar_lea.vmem %s4169_s6, %s2234_s14 }
 0x17a   : > { %1382 = vst [vmem:[#allocation2 + $0x20] sm:$0xf0] %v1366_v11  ;;  %1098 = vrot.lane.b32.xlu0 %v3112_v56, %s2904_s18  ;;  %s383_s18 = scalar_lea.vmem %s4168_s5, %s2234_s14 }
 0x17b   : > { %v3738_v29 = vpop.permute.xlu1 %2699 }
 0x17c   : > { %v2701_v54 = vunpack.i.l.bf16 %v3738_v29  ;;  %v2695_v34 = vpop.permute.xlu0 %2694 }
 0x17d   : > { %v2697_v23 = vunpack.i.h.bf16 %v2695_v34  ;;  %v2696_v41 = vunpack.i.l.bf16 %v2695_v34  ;;  %v3741_v17 = vpop.permute.xlu2 %2749 }
 0x17e   : > { %v1411_v18 = vsel %vm1407_vm6, %v2657_v38, %v2701_v54  ;;  %v2752_v16 = vunpack.i.h.bf16 %v3741_v17  ;;  %v2751_v56 = vunpack.i.l.bf16 %v3741_v17  ;;  %v1688_v45 = vld [vmem:[#allocation2 + $0x68] sm:$0xff] }
 0x17f   : > { %1427 = vst [vmem:[#allocation2 + $0x1d0] sm:$0xf] %v1411_v18  ;;  %v1409_v55 = vsel %vm1407_vm6, %v2697_v23, %v2656_v10  ;;  %v1408_v25 = vsel %vm1407_vm6, %v2696_v41, %v2697_v23  ;;  %v1705_v37 = vld [vmem:[#allocation2 + $0x118] sm:$0xff]  ;;  %1791 = vmatpush.msra.mxu2 %v1688_v45 }
 0x180   : > { %1425 = vst [vmem:[#allocation2 + $0x168] sm:$0xf] %v1409_v55  ;;  %v1146_v40 = vsel %vm1143_vm9, %v2751_v56, %v2752_v16  ;;  %1809 = vmatpush.msra.mxu3 %v1705_v37 }
 0x181   : > { %1424 = vst [vmem:[#allocation2 + $0x348] sm:$0xf] %v1408_v25 }
 0x182   : > { %1162 = vst [vmem:[#allocation2 + $0xa8] sm:$0xf] %v1146_v40 }
 0x183   : > { %v3759_v6 = vpop.permute.xlu1 %2714 }
 0x184   : > { %v2717_v30 = vunpack.i.h.bf16 %v3759_v6  ;;  %v2716_v38 = vunpack.i.l.bf16 %v3759_v6  ;;  %v3763_v10 = vpop.permute.xlu0 %2709 }
 0x185   : > { %v2711_v35 = vunpack.i.l.bf16 %v3763_v10  ;;  %v3766_v4 = vpop.permute.xlu2 %2764 }
 0x186   : > { %v1235_v53 = vsel %vm1232_vm10, %v2716_v38, %v2717_v30  ;;  %v2766_v21 = vunpack.i.l.bf16 %v3766_v4 }
 0x187   : > { %1251 = vst [vmem:[#allocation2 + $0x1e0] sm:$0xf] %v1235_v53  ;;  %v1454_v28 = vsel %vm1450_vm1, %v2662_v33, %v2711_v35  ;;  %v1695_v48 = vld [vmem:[#allocation2 + $0x168] sm:$0xff]  ;;  %v2672_v33 = vunpack.i.h.bf16 %v3689_v26 }
 0x188   : > { %1470 = vst [vmem:[#allocation2 + $0x1d0] sm:$0xf0] %v1454_v28  ;;  %v1236_v49 = vsel %vm1232_vm10, %v2717_v30, %v2766_v21  ;;  %v1694_v31 = vld [vmem:[#allocation2 + $0x348] sm:$0xff]  ;;  %1770 = vmatpush.msra.mxu1 %v1695_v48 }
 0x189   : > { %1252 = vst [vmem:[#allocation2 + $0x50] sm:$0xf] %v1236_v49  ;;  %1750 = vmatpush.msra.mxu0 %v1694_v31 }
 0x18b   : > { %v3780_v50 = vpop.permute.xlu1 %2729 }
 0x18c   : > { %v2731_v42 = vunpack.i.l.bf16 %v3780_v50  ;;  %v2725_v15 = vpop.permute.xlu0 %2724 }
 0x18d   : > { %v2727_v60 = vunpack.i.h.bf16 %v2725_v15  ;;  %v2726_v8 = vunpack.i.l.bf16 %v2725_v15  ;;  %v3783_v5 = vpop.permute.xlu2 %2779 }
 0x18e   : > { %v1325_v12 = vsel %vm1321_vm8, %v2687_v57, %v2731_v42  ;;  %v2782_v52 = vunpack.i.h.bf16 %v3783_v5  ;;  %v2781_v24 = vunpack.i.l.bf16 %v3783_v5  ;;  %v1680_v19 = vld [vmem:[#allocation2 + $0x1e0] sm:$0xff] }
 0x18f   : > { %1341 = vst [vmem:[#allocation2 + $0x78] sm:$0xf] %v1325_v12  ;;  %v1323_v20 = vsel %vm1321_vm8, %v2727_v60, %v2686_v1  ;;  %v1322_v36 = vsel %vm1321_vm8, %v2726_v8, %v2727_v60  ;;  %v1697_v46 = vld [vmem:[#allocation2 + $0x1d0] sm:$0xff]  ;;  %1792 = vmatpush.msra.mxu2 %v1680_v19  ;;  %v2652_v1 = vunpack.i.h.bf16 %v3666_v13 }
 0x190   : > { %1339 = vst [vmem:[#allocation2 + $0x20] sm:$0xf] %v1323_v20  ;;  %v1498_v51 = vsel %vm1493_vm3, %v2671_v44, %v2782_v52  ;;  %v1499_v57 = vsel %vm1493_vm3, %v2782_v52, %v2672_v33  ;;  %1810 = vmatpush.msra.mxu3 %v1697_v46  ;;  %v1500_v22 = vsel %vm1493_vm3, %v2672_v33, %v2781_v24  ;;  %v1664_v46 = vld [vmem:[#allocation2 + $0x1c8] sm:$0xff] }
 0x191   : > { %1338 = vst [vmem:[#allocation2 + $0x140] sm:$0xf] %v1322_v36 }
 0x192   : > { %1514 = vst [vmem:[#allocation2 + $0x88] sm:$0xf] %v1498_v51 }
 0x193   : > { %1515 = vst [vmem:[#allocation2 + $0x368] sm:$0xf] %v1499_v57  ;;  %v3804_v58 = vpop.permute.xlu1 %2744 }
 0x194   : > { %1516 = vst [vmem:[#allocation2 + $0x180] sm:$0xf] %v1500_v22  ;;  %v2747_v39 = vunpack.i.h.bf16 %v3804_v58  ;;  %v2746_v26 = vunpack.i.l.bf16 %v3804_v58  ;;  %v3809_v44 = vpop.permute.xlu0 %2739  ;;  %v1656_v22 = vld [vmem:[#allocation2 + $0x178] sm:$0xff] }
 0x195   : > { %v2741_v47 = vunpack.i.l.bf16 %v3809_v44  ;;  %v2790_v3 = vpop.permute.xlu2 %2789 }
 0x196   : > { %v1584_v9 = vsel %vm1579_vm15, %v2651_v0, %v2747_v39  ;;  %v1585_v11 = vsel %vm1579_vm15, %v2747_v39, %v2652_v1  ;;  %v1586_v61 = vsel %vm1579_vm15, %v2652_v1, %v2746_v26  ;;  %v2792_v34 = vunpack.i.h.bf16 %v2790_v3  ;;  %v1648_v39 = vld [vmem:[#allocation2 + $0x358] sm:$0xff] }
 0x197   : > { %1600 = vst [vmem:[#allocation2] sm:$0xf] %v1584_v9  ;;  %v1368_v23 = vsel %vm1364_vm5, %v2692_v2, %v2741_v47  ;;  %v2791_v41 = vunpack.i.l.bf16 %v2790_v3  ;;  %v1687_v18 = vld [vmem:[#allocation2 + $0x20] sm:$0xff] }
 0x198   : > { %1601 = vst [vmem:[#allocation2 + $0x2a0] sm:$0xf] %v1585_v11  ;;  %v1686_v45 = vld [vmem:[#allocation2 + $0x140] sm:$0xff]  ;;  %1771 = vmatpush.msra.mxu1 %v1687_v18  ;;  %v1145_v0 = vsel %vm1143_vm9, %v2792_v34, %v2751_v56  ;;  %v1640_v18 = vld [vmem:[#allocation2 + $0xb8] sm:$0xff] }
 0x199   : > { %1602 = vst [vmem:[#allocation2 + $0x1b0] sm:$0xf] %v1586_v61  ;;  %v1144_v13 = vsel %vm1143_vm9, %v2791_v41, %v2792_v34  ;;  %1751 = vmatpush.msra.mxu0 %v1686_v45  ;;  %v1632_v45 = vld [vmem:[#allocation2 + $0x1a0] sm:$0xff] }
 0x19a   : > { %1384 = vst [vmem:[#allocation2 + $0x78] sm:$0xf0] %v1368_v23 }
 0x19b   : > { %1160 = vst [vmem:[#allocation2 + $0x218] sm:$0xf] %v1144_v13  ;;  %v2760_v55 = vpop.permute.xlu1 %2759 }
 0x19c   : > { %1161 = vst [vmem:[#allocation2 + $0x370] sm:$0xf] %v1145_v0  ;;  %v2762_v7 = vunpack.i.h.bf16 %v2760_v55  ;;  %v2761_v25 = vunpack.i.l.bf16 %v2760_v55  ;;  %v3826_v2 = vpop.permute.xlu0 %2754  ;;  %v1624_v55 = vld [vmem:[#allocation2 + $0x2d0] sm:$0xff] }
 0x19d   : > { %v2757_v37 = vunpack.i.h.bf16 %v3826_v2  ;;  %v2756_v40 = vunpack.i.l.bf16 %v3826_v2  ;;  %v3830_v30 = vpop.permute.xlu2 %2804 }
 0x19e   : > { %v1233_v53 = vsel %vm1232_vm10, %v2761_v25, %v2762_v7  ;;  %v1234_v56 = vsel %vm1232_vm10, %v2762_v7, %v2716_v38  ;;  %v2806_v28 = vunpack.i.l.bf16 %v3830_v30  ;;  %v2767_v7 = vunpack.i.h.bf16 %v3766_v4 }
 0x19f   : > { %1249 = vst [vmem:[#allocation2 + $0x30] sm:$0xf] %v1233_v53  ;;  %v1189_v48 = vsel %vm1186_vm11, %v2756_v40, %v2757_v37  ;;  %v2712_v4 = vunpack.i.h.bf16 %v3763_v10 }
 0x1a0   : > { %1250 = vst [vmem:[#allocation2 + $0x210] sm:$0xf] %v1234_v56  ;;  %v1190_v49 = vsel %vm1186_vm11, %v2757_v37, %v2806_v28 }
 0x1a1   : > { %1205 = vst [vmem:[#allocation2 + $0xa8] sm:$0xf0] %v1189_v48  ;;  %v1689_v31 = vld [vmem:[#allocation2 + $0x78] sm:$0xff] }
 0x1a2   : > { %1206 = vst [vmem:[#allocation2 + $0xc8] sm:$0xf0] %v1190_v49  ;;  %1811 = vmatpush.msra.mxu3 %v1689_v31  ;;  %v1616_v31 = vld [vmem:[#allocation2 + $0x90] sm:$0xff] }
 0x1a3   : > { %v3843_v15 = vpop.permute.xlu1 %2774 }
 0x1a4   : > { %v2776_v6 = vunpack.i.l.bf16 %v3843_v15  ;;  %v2770_v38 = vpop.permute.xlu0 %2769 }
 0x1a5   : > { %v2772_v60 = vunpack.i.h.bf16 %v2770_v38  ;;  %v2771_v8 = vunpack.i.l.bf16 %v2770_v38  ;;  %v1492_v33 = vpop.permute.xlu2 %1491 }
 0x1a6   : > { %v1282_v12 = vsel %vm1278_vm7, %v2722_v27, %v2776_v6  ;;  %v1501_v20 = vsel %vm1493_vm3, %v2781_v24, %v1492_v33  ;;  %v1716_v33 = vld [vmem:[#allocation2 + $0x1b0] sm:$0xf] }
 0x1a7   : > { %1298 = vst [vmem:[#allocation2 + $0x50] sm:$0xf0] %v1282_v12  ;;  %v1279_v52 = vsel %vm1278_vm7, %v2771_v8, %v2772_v60  ;;  %v1280_v19 = vsel %vm1278_vm7, %v2772_v60, %v2721_v14  ;;  %v1608_v60 = vld [vmem:[#allocation2 + $0x10] sm:$0xff] }
 0x1a8   : > { %1295 = vst [vmem:[#allocation2 + $0x30] sm:$0xf0] %v1279_v52  ;;  %v1672_v36 = vld [vmem:[#allocation2 + $0xa8] sm:$0xff] }
 0x1a9   : > { %1296 = vst [vmem:[#allocation2 + $0x210] sm:$0xf0] %v1280_v19  ;;  %1793 = vmatpush.msra.mxu2 %v1672_v36 }
 0x1aa   : > { %1517 = vst [vmem:[#allocation2 + $0x250] sm:$0xf] %v1501_v20 }
 0x1ab   : > { %1794 = vmatpush.msra.mxu2 %v1664_v46  ;;  %v1578_v51 = vpop.permute.xlu1 %1577  ;;  %v2702_v46 = vunpack.i.h.bf16 %v3738_v29  ;;  %v1663_v29 = vld [vmem:[#allocation2 + $0xf8] sm:$0xff] }
 0x1ac   : > { %v1587_v27 = vsel %vm1579_vm15, %v2746_v26, %v1578_v51  ;;  %v3859_v57 = vpop.permute.xlu0 %2784  ;;  %v2742_v26 = vunpack.i.h.bf16 %v3809_v44 }
 0x1ad   : > { %1603 = vst [vmem:[#allocation2 + $0x150] sm:$0xf] %v1587_v27  ;;  %v2787_v14 = vunpack.i.h.bf16 %v3859_v57  ;;  %v2786_v5 = vunpack.i.l.bf16 %v3859_v57  ;;  %v3864_v24 = vpop.permute.xlu2 %2824  ;;  %1795 = vmatpush.msra.mxu2 %v1656_v22  ;;  %v1649_v57 = vld [vmem:[#allocation2 + $0x1c0] sm:$0xff] }
 0x1ae   : > { %v2827_v58 = vunpack.i.h.bf16 %v3864_v24  ;;  %v2826_v1 = vunpack.i.l.bf16 %v3864_v24  ;;  %v1681_v3 = vld [vmem:[#allocation2 + $0x50] sm:$0xff]  ;;  %v1657_v24 = vld [vmem:[#allocation2 + $0x200] sm:$0xff] }
 0x1af   : > { %v1541_v9 = vsel %vm1536_vm2, %v2681_v59, %v2787_v14  ;;  %v1542_v11 = vsel %vm1536_vm2, %v2787_v14, %v2682_v32  ;;  %v1543_v61 = vsel %vm1536_vm2, %v2682_v32, %v2786_v5  ;;  %1796 = vmatpush.msra.mxu2 %v1648_v39  ;;  %v1678_v34 = vld [vmem:[#allocation2 + $0x30] sm:$0xff]  ;;  %1812 = vmatpush.msra.mxu3 %v1681_v3 }
 0x1b0   : > { %1557 = vst [vmem:[#allocation2 + $0x88] sm:$0xf0] %v1541_v9  ;;  %v1369_v23 = vsel %vm1364_vm5, %v2741_v47, %v2827_v58  ;;  %1752 = vmatpush.msra.mxu0 %v1678_v34  ;;  %v1679_v41 = vld [vmem:[#allocation2 + $0x210] sm:$0xff]  ;;  %v1370_v62 = vsel %vm1364_vm5, %v2827_v58, %v2742_v26  ;;  %v1371_v59 = vsel %vm1364_vm5, %v2742_v26, %v2826_v1  ;;  %v1654_v26 = vld [vmem:[#allocation2 + $0x2b8] sm:$0xff]  ;;  %v2732_v34 = vunpack.i.h.bf16 %v3780_v50 }
 0x1b1   : > { %1558 = vst [vmem:[#allocation2 + $0x368] sm:$0xf0] %v1542_v11  ;;  %1772 = vmatpush.msra.mxu1 %v1679_v41  ;;  %1797 = vmatpush.msra.mxu2 %v1640_v18  ;;  %v1662_v39 = vld [vmem:[#allocation2 + $0x270] sm:$0xff]  ;;  %v1639_v50 = vld [vmem:[#allocation2 + $0x298] sm:$0xff] }
 0x1b2   : > { %1559 = vst [vmem:[#allocation2 + $0x180] sm:$0xf0] %v1543_v61  ;;  %v1655_v61 = vld [vmem:[#allocation2 + $0x228] sm:$0xff] }
 0x1b3   : > { %1385 = vst [vmem:[#allocation2 + $0x188] sm:$0xf0] %v1369_v23  ;;  %1798 = vmatpush.msra.mxu2 %v1632_v45  ;;  %v2800_v13 = vpop.permute.xlu1 %2799 }
 0x1b4   : > { %1386 = vst [vmem:[#allocation2 + $0x238] sm:$0xf0] %v1370_v62  ;;  %v2802_v44 = vunpack.i.h.bf16 %v2800_v13  ;;  %v2801_v47 = vunpack.i.l.bf16 %v2800_v13  ;;  %v3883_v0 = vpop.permute.xlu0 %2794 }
 0x1b5   : > { %1387 = vst [vmem:[#allocation2 + $0x2c8] sm:$0xf0] %v1371_v59  ;;  %v2796_v25 = vunpack.i.l.bf16 %v3883_v0  ;;  %v3887_v37 = vpop.permute.xlu2 %2829  ;;  %1799 = vmatpush.msra.mxu2 %v1624_v55  ;;  %v1647_v59 = vld [vmem:[#allocation2 + $0x2f0] sm:$0xff]  ;;  %v1638_v55 = vld [vmem:[#allocation2 + $0xd8] sm:$0xff] }
 0x1b6   : > { %v1187_v53 = vsel %vm1186_vm11, %v2801_v47, %v2802_v44  ;;  %v1188_v56 = vsel %vm1186_vm11, %v2802_v44, %v2756_v40  ;;  %v2832_v48 = vunpack.i.h.bf16 %v3887_v37  ;;  %v2831_v49 = vunpack.i.l.bf16 %v3887_v37 }
 0x1b7   : > { %1203 = vst [vmem:[#allocation2 + $0x218] sm:$0xf0] %v1187_v53  ;;  %v1147_v38 = vsel %vm1143_vm9, %v2752_v16, %v2796_v25  ;;  %1800 = vmatpush.msra.mxu2 %v1616_v31  ;;  %v1631_v53 = vld [vmem:[#allocation2 + $0x120] sm:$0xff]  ;;  %v1622_v31 = vld [vmem:[#allocation2 + $0x28] sm:$0xff] }
 0x1b8   : > { %1204 = vst [vmem:[#allocation2 + $0x370] sm:$0xf0] %v1188_v56  ;;  %v1237_v2 = vsel %vm1232_vm10, %v2766_v21, %v2832_v48  ;;  %v1238_v40 = vsel %vm1232_vm10, %v2832_v48, %v2767_v7  ;;  %v1239_v8 = vsel %vm1232_vm10, %v2767_v7, %v2831_v49  ;;  %v1630_v7 = vld [vmem:[#allocation2 + $0x350] sm:$0xff]  ;;  %v3963_v56 = vld [vmem:[%s366_s17] sm:$0xff]  ;;  %v1633_v48 = vld [vmem:[#allocation2 + $0x260] sm:$0xff] }
 0x1b9   : > { %1163 = vst [vmem:[#allocation2 + $0xc8] sm:$0xf] %v1147_v38  ;;  %1801 = vmatpush.msra.mxu2 %v1608_v60  ;;  %v1708_v17 = vld [vmem:[#allocation2 + $0x180] sm:$0xff]  ;;  %v3966_v38 = vperm.slane %v3963_v56, 0  ;;  %v3969_v37 = vperm.slane %v3963_v56, 1 }
 0x1ba   : > { %1253 = vst [vmem:[#allocation2 + $0x80] sm:$0xf] %v1237_v2 }
 0x1bb   : > { %2248 = vmatpush.msk.msrb.mxu2 %vm1721_vm0, %v1716_v33  ;;  %1254 = vst [vmem:[#allocation2 + $0x1f0] sm:$0xf] %v1238_v40  ;;  %v3908_v16 = vpop.permute.xlu1 %2814  ;;  %v1623_v40 = vld [vmem:[#allocation2 + $0x330] sm:$0xff]  ;;  %v1625_v33 = vld [vmem:[#allocation2 + $0x198] sm:$0xff] }
 0x1bc   : > { %1255 = vst [vmem:[#allocation2 + $0x160] sm:$0xf] %v1239_v8  ;;  %v2817_v21 = vunpack.i.h.bf16 %v3908_v16  ;;  %v2816_v12 = vunpack.i.l.bf16 %v3908_v16  ;;  %v3913_v52 = vpop.permute.xlu0 %2809 }
 0x1bd   : > { %1869 = vmatpush.msrb.mxu2 %v1708_v17  ;;  %v2812_v19 = vunpack.i.h.bf16 %v3913_v52  ;;  %v2811_v20 = vunpack.i.l.bf16 %v3913_v52  ;;  %v1363_v36 = vpop.permute.xlu2 %1362  ;;  %v1614_v17 = vld [vmem:[#allocation2 + $0x108] sm:$0xff]  ;;  %v1714_v52 = vld [vmem:[#allocation2] sm:$0xf] }
 0x1be   : > { %v1455_v51 = vsel %vm1450_vm1, %v2711_v35, %v2817_v21  ;;  %v1456_v27 = vsel %vm1450_vm1, %v2817_v21, %v2712_v4  ;;  %v1457_v22 = vsel %vm1450_vm1, %v2712_v4, %v2816_v12  ;;  %v1670_v32 = vld [vmem:[#allocation2 + $0x218] sm:$0xff]  ;;  %v1372_v9 = vsel %vm1364_vm5, %v2826_v1, %v1363_v36 }
 0x1bf   : > { %1471 = vst [vmem:[#allocation2 + $0x280] sm:$0xf0] %v1455_v51  ;;  %v1412_v14 = vsel %vm1407_vm6, %v2701_v54, %v2812_v19  ;;  %1753 = vmatpush.msra.mxu0 %v1670_v32  ;;  %v1671_v58 = vld [vmem:[#allocation2 + $0x370] sm:$0xff]  ;;  %v1413_v10 = vsel %vm1407_vm6, %v2812_v19, %v2702_v46  ;;  %v1414_v3 = vsel %vm1407_vm6, %v2702_v46, %v2811_v20  ;;  %v1646_v1 = vld [vmem:[#allocation2 + $0x1f8] sm:$0xff]  ;;  %v3975_v4 = vperm.slane %v3963_v56, 2 }
 0x1c0   : > { %1472 = vst [vmem:[#allocation2 + $0x300] sm:$0xf0] %v1456_v27  ;;  %1773 = vmatpush.msra.mxu1 %v1671_v58  ;;  %v1673_v35 = vld [vmem:[#allocation2 + $0xc8] sm:$0xff]  ;;  %v1665_v54 = vld [vmem:[#allocation2 + $0xb0] sm:$0xff]  ;;  %v1933_v21 = vsel %vm1932_vm12, %v3966_v38, 0.0  ;;  %v1934_v19 = vsel %vm1932_vm12, %v3969_v37, 0.0 }
 0x1c1   : > { %1473 = vst [vmem:[#allocation2 + $0x308] sm:$0xf0] %v1457_v22  ;;  %1813 = vmatpush.msra.mxu3 %v1673_v35  ;;  %1754 = vmatpush.msra.mxu0 %v1662_v39  ;;  %v1935_v36 = vadd.f32 %v1934_v19, %v1933_v21  ;;  %v1617_v46 = vld [vmem:[#allocation2 + $0x318] sm:$0xff]  ;;  %v1606_v51 = vld [vmem:[#allocation2 + $0x2b0] sm:$0xff]  ;;  %v3985_v27 = vperm.slane %v3963_v56, 3  ;;  %v1936_v22 = vsel %vm1932_vm12, %v3975_v4, 0.0 }
 0x1c2   : > { %1428 = vst [vmem:[#allocation2 + $0x280] sm:$0xf] %v1412_v14  ;;  %1774 = vmatpush.msra.mxu1 %v1663_v29  ;;  %v1607_v32 = vld [vmem:[#allocation2 + $0xd0] sm:$0xff]  ;;  %v1715_v39 = vld [vmem:[#allocation2 + $0x2a0] sm:$0xf] }
 0x1c3   : > { %1429 = vst [vmem:[#allocation2 + $0x300] sm:$0xf] %v1413_v10  ;;  %1814 = vmatpush.msra.mxu3 %v1665_v54  ;;  %v3941_v11 = vpop.permute.xlu1 %2819  ;;  %1755 = vmatpush.msra.mxu0 %v1654_v26  ;;  %v1937_v14 = vadd.f32 %v1936_v22, %v1935_v36  ;;  %v3991_v10 = vperm.slane %v3963_v56, 4  ;;  %v1938_v35 = vsel %vm1932_vm12, %v3985_v27, 0.0  ;;  %v1706_v54 = vld [vmem:[#allocation2 + $0x88] sm:$0xff]  ;;  %v3998_v26 = vperm.slane %v3963_v56, 5 }
 0x1c4   : > { %1430 = vst [vmem:[#allocation2 + $0x308] sm:$0xf] %v1414_v3  ;;  %v2822_v23 = vunpack.i.h.bf16 %v3941_v11  ;;  %v2821_v41 = vunpack.i.l.bf16 %v3941_v11  ;;  %v1535_v18 = vpop.permute.xlu0 %1534  ;;  %1775 = vmatpush.msra.mxu1 %v1655_v61  ;;  %v1717_v3 = vld [vmem:[#allocation2 + $0x150] sm:$0xf]  ;;  %v1707_v61 = vld [vmem:[#allocation2 + $0x368] sm:$0xff] }
 0x1c5   : > { %v1544_v62 = vsel %vm1536_vm2, %v2786_v5, %v1535_v18  ;;  %1815 = vmatpush.msra.mxu3 %v1657_v24  ;;  %1756 = vmatpush.msra.mxu0 %v1646_v1  ;;  %1388 = vst [vmem:[#allocation2 + $0x70] sm:$0xf0] %v1372_v9  ;;  %v1231_v45 = vpop.permute.xlu2 %1230  ;;  %v1641_v5 = vld [vmem:[#allocation2 + $0x170] sm:$0xff]  ;;  %v1939_v29 = vadd.f32 %v1938_v35, %v1937_v14  ;;  %v1940_v9 = vsel %vm1932_vm12, %v3991_v10, 0.0 }
 0x1c6   : > { %v1326_v13 = vsel %vm1321_vm8, %v2731_v42, %v2822_v23  ;;  %v1327_v44 = vsel %vm1321_vm8, %v2822_v23, %v2732_v34  ;;  %v1328_v47 = vsel %vm1321_vm8, %v2732_v34, %v2821_v41  ;;  %1560 = vst [vmem:[#allocation2 + $0x250] sm:$0xf0] %v1544_v62  ;;  %1776 = vmatpush.msra.mxu1 %v1647_v59  ;;  %v4008_v59 = vperm.slane %v3963_v56, 6 }
 0x1c7   : > { %1342 = vst [vmem:[#allocation2 + $0x188] sm:$0xf] %v1326_v13  ;;  %1816 = vmatpush.msra.mxu3 %v1649_v57  ;;  %1757 = vmatpush.msra.mxu0 %v1638_v55  ;;  %v1240_v42 = vsel %vm1232_vm10, %v2831_v49, %v1231_v45  ;;  %v1941_v18 = vadd.f32 %v1940_v9, %v1939_v29  ;;  %v1942_v45 = vsel %vm1932_vm12, %v3998_v26, 0.0  ;;  %v2777_v13 = vunpack.i.h.bf16 %v3843_v15  ;;  %v1667_v9 = vld [vmem:[#allocation2 + $0x2c0] sm:$0xff] }
 0x1c8   : > { %1343 = vst [vmem:[#allocation2 + $0x238] sm:$0xf] %v1327_v44  ;;  %1777 = vmatpush.msra.mxu1 %v1639_v50  ;;  %v4016_v50 = vperm.slane %v3963_v56, 7 }
 0x1c9   : > { %1344 = vst [vmem:[#allocation2 + $0x2c8] sm:$0xf] %v1328_v47  ;;  %1817 = vmatpush.msra.mxu3 %v1641_v5  ;;  %1758 = vmatpush.msra.mxu0 %v1630_v7  ;;  %v1698_v62 = vld [vmem:[#allocation2 + $0x280] sm:$0xff] }
 0x1ca   : > { %1778 = vmatpush.msra.mxu1 %v1631_v53  ;;  %1256 = vst [vmem:[#allocation2 + $0x60] sm:$0xf] %v1240_v42  ;;  %v1699_v11 = vld [vmem:[#allocation2 + $0x300] sm:$0xff]  ;;  %v1944_v42 = vsel %vm1932_vm12, %v4008_v59, 0.0  ;;  %v1946_v56 = vsel %vm1932_vm12, %v4016_v50, 0.0 }
 0x1cb   : > { %v1700_v49 = vld [vmem:[#allocation2 + $0x308] sm:$0xff]  ;;  %1818 = vmatpush.msra.mxu3 %v1633_v48  ;;  %v1449_v2 = vpop.permute.xlu1 %1448  ;;  %1759 = vmatpush.msra.mxu0 %v1622_v31 }
 0x1cc   : > { %1870 = vmatpush.msrb.mxu2 %v1700_v49  ;;  %v1458_v60 = vsel %vm1450_vm1, %v2816_v12, %v1449_v2  ;;  %v1406_v8 = vpop.permute.xlu0 %1405  ;;  %1779 = vmatpush.msra.mxu1 %v1623_v40  ;;  %v1615_v12 = vld [vmem:[#allocation2 + $0x110] sm:$0xff]  ;;  %v2807_v2 = vunpack.i.h.bf16 %v3830_v30 }
 0x1cd   : > { %1474 = vst [vmem:[#allocation2 + $0x290] sm:$0xf0] %v1458_v60  ;;  %v1415_v16 = vsel %vm1407_vm6, %v2811_v20, %v1406_v8  ;;  %1819 = vmatpush.msra.mxu3 %v1625_v33  ;;  %1760 = vmatpush.msra.mxu0 %v1614_v17  ;;  %v1609_v20 = vld [vmem:[#allocation2 + $0x48] sm:$0xff]  ;;  %v1709_v34 = vld [vmem:[#allocation2 + $0x250] sm:$0xff] }
 0x1ce   : > { %1431 = vst [vmem:[#allocation2 + $0x290] sm:$0xf] %v1415_v16  ;;  %1780 = vmatpush.msra.mxu1 %v1615_v12  ;;  %v1690_v55 = vld [vmem:[#allocation2 + $0x188] sm:$0xff]  ;;  %v2797_v16 = vunpack.i.h.bf16 %v3883_v0 }
 0x1cf   : > { %1820 = vmatpush.msra.mxu3 %v1617_v46  ;;  %1761 = vmatpush.msra.mxu0 %v1606_v51  ;;  %v1691_v48 = vld [vmem:[#allocation2 + $0x238] sm:$0xff] }
 0x1d0   : > { %1781 = vmatpush.msra.mxu1 %v1607_v32  ;;  %v1692_v58 = vld [vmem:[#allocation2 + $0x2c8] sm:$0xff]  ;;  %v1185_v32 = vpop.permute.xlu2 %1184 }
 0x1d1   : > { %2244 = vmatpush.msk.msrb.mxu0 %vm1721_vm0, %v1714_v52  ;;  %1821 = vmatpush.msra.mxu3 %v1609_v20 }
 0x1d2   : > { %1871 = vmatpush.msrb.mxu2 %v1692_v58  ;;  %2246 = vmatpush.msk.msrb.mxu1 %vm1721_vm0, %v1715_v39 }
 0x1d3   : > { %2250 = vmatpush.msk.msrb.mxu3 %vm1721_vm0, %v1717_v3  ;;  %1829 = vmatpush.msrb.mxu0 %v1706_v54  ;;  %v1320_v23 = vpop.permute.xlu1 %1319  ;;  %v1666_v54 = vld [vmem:[#allocation2 + $0x138] sm:$0xff]  ;;  %vm2009_vm0 = vcmask 7168  }
 0x1d4   : > { %1849 = vmatpush.msrb.mxu1 %v1707_v61  ;;  %v1329_v24 = vsel %vm1321_vm8, %v2821_v41, %v1320_v23  ;;  %v4005_v1 = vpop.permute.xlu0 %2834  ;;  %v1943_v41 = vadd.f32 %v1942_v45, %v1941_v18  ;;  %v1658_v18 = vld [vmem:[#allocation2 + $0x2e8] sm:$0xff] }
 0x1d5   : > { %1889 = vmatpush.msrb.mxu3 %v1709_v34  ;;  %1345 = vst [vmem:[#allocation2 + $0x70] sm:$0xf] %v1329_v24  ;;  %v2837_v44 = vunpack.i.h.bf16 %v4005_v1  ;;  %v2836_v47 = vunpack.i.l.bf16 %v4005_v1  ;;  %1830 = vmatpush.msrb.mxu0 %v1698_v62  ;;  %v1701_v57 = vld [vmem:[#allocation2 + $0x290] sm:$0xff]  ;;  %v1668_v34 = vld [vmem:[#allocation2 + $0xe8] sm:$0xff]  ;;  %v1660_v62 = vld [vmem:[#allocation2 + $0x2f8] sm:$0xff] }
 0x1d6   : > { %1850 = vmatpush.msrb.mxu1 %v1699_v11  ;;  %v1945_v31 = vadd.f32 %v1944_v42, %v1943_v41  ;;  %v1659_v1 = vld [vmem:[#allocation2 + $0x208] sm:$0xff]  ;;  %v1642_v11 = vld [vmem:[#allocation2 + $0x98] sm:$0xff]  ;;  %v1635_v41 = vld [vmem:[#allocation2 + $0x130] sm:$0xff] }
 0x1d7   : > { %1890 = vmatpush.msrb.mxu3 %v1701_v57  ;;  %v1283_v5 = vsel %vm1278_vm7, %v2776_v6, %v2837_v44  ;;  %v1284_v7 = vsel %vm1278_vm7, %v2837_v44, %v2777_v13  ;;  %v1285_v53 = vsel %vm1278_vm7, %v2777_v13, %v2836_v47  ;;  %1831 = vmatpush.msrb.mxu0 %v1690_v55  ;;  %v1604_v6 = vld [vmem:[%s4165_s2] sm:$0xf]  ;;  %v1650_v45 = vld [vmem:[#allocation2 + $0x248] sm:$0xff]  ;;  %v1651_v13 = vld [vmem:[#allocation2 + $0x340] sm:$0xff] }
 0x1d8   : > { %1299 = vst [vmem:[#allocation2 + $0x80] sm:$0xf0] %v1283_v5  ;;  %1851 = vmatpush.msrb.mxu1 %v1691_v48  ;;  %v1947_v49 = vadd.f32 %v1946_v56, %v1945_v31  ;;  %v4033_v17 = vunpack.c.l.bf16 %v1604_v6  ;;  %v1634_v57 = vld [vmem:[#allocation2 + $0xe0] sm:$0xff]  ;;  %v1636_v55 = vld [vmem:[#allocation2 + $0x1e8] sm:$0xff] }
 0x1d9   : > { %1300 = vst [vmem:[#allocation2 + $0x1f0] sm:$0xf0] %v1284_v7  ;;  %v1626_v42 = vld [vmem:[#allocation2 + $0x1a8] sm:$0xff]  ;;  %v1627_v7 = vld [vmem:[#allocation2 + $0x158] sm:$0xff]  ;;  %v1619_v31 = vld [vmem:[#allocation2 + $0x100] sm:$0xff] }
 0x1da   : > { %1301 = vst [vmem:[#allocation2 + $0x160] sm:$0xf0] %v1285_v53  ;;  %1948 = vadd.xlane.f32.xlu1 %v1947_v49  ;;  %2241 = vmatmul.msk.f32.vlgmr.msra.gmra.mxu2 %vm666_vm4, %v4033_v17  ;;  %v1628_v53 = vld [vmem:[#allocation2 + $0x2e0] sm:$0xff]  ;;  %v1618_v48 = vld [vmem:[#allocation2 + $0x148] sm:$0xff]  ;;  %v1620_v49 = vld [vmem:[#allocation2 + $0x58] sm:$0xff] }
 0x1db   : > { %v2845_v15 = vpop.permute.xlu1 %2844  ;;  %2237 = vmatmul.msk.f32.vlgmr.msra.gmra.mxu0 %vm666_vm4, %v4033_v17  ;;  %2243 = vmatmul.msk.f32.vlgmr.msra.gmra.mxu3 %vm666_vm4, %v4033_v17  ;;  %v1661_v56 = vld [vmem:[#allocation2 + $0x268] sm:$0xff] }
 0x1dc   : > { %v2847_v40 = vunpack.i.h.bf16 %v2845_v15  ;;  %v2846_v60 = vunpack.i.l.bf16 %v2845_v15  ;;  %v2840_v8 = vpop.permute.xlu0 %2839  ;;  %v1693_v33 = vld [vmem:[#allocation2 + $0x70] sm:$0xff]  ;;  %2239 = vmatmul.msk.f32.vlgmr.msra.gmra.mxu1 %vm666_vm4, %v4033_v17  ;;  %v1610_v15 = vld [vmem:[#allocation2 + $0x360] sm:$0xff]  ;;  %v1611_v6 = vld [vmem:[#allocation2 + $0x328] sm:$0xff] }
 0x1dd   : > { %v2842_v21 = vunpack.i.h.bf16 %v2840_v8  ;;  %v2841_v19 = vunpack.i.l.bf16 %v2840_v8  ;;  %1891 = vmatpush.msrb.mxu3 %v1693_v33  ;;  %v1637_v8 = vld [vmem:[#allocation2 + $0x38] sm:$0xff] }
 0x1de   : > { %v1191_v12 = vsel %vm1186_vm11, %v2806_v28, %v2847_v40  ;;  %v1192_v36 = vsel %vm1186_vm11, %v2847_v40, %v2807_v2  ;;  %v1193_v46 = vsel %vm1186_vm11, %v2807_v2, %v2846_v60  ;;  %v1194_v58 = vsel %vm1186_vm11, %v2846_v60, %v1185_v32  ;;  %v1653_v2 = vld [vmem:[#allocation2 + $0x310] sm:$0xff]  ;;  %v1612_v40 = vld [vmem:[#allocation2 + $0x40] sm:$0xff]  ;;  %v1629_v33 = vld [vmem:[#allocation2 + $0x278] sm:$0xff] }
 0x1df   : > { %1207 = vst [vmem:[#allocation2 + $0x338] sm:$0xf0] %v1191_v12  ;;  %v1148_v51 = vsel %vm1143_vm9, %v2796_v25, %v2842_v21  ;;  %v1682_v22 = vld [vmem:[#allocation2 + $0x80] sm:$0xff]  ;;  %v1149_v30 = vsel %vm1143_vm9, %v2842_v21, %v2797_v16  ;;  %v1150_v0 = vsel %vm1143_vm9, %v2797_v16, %v2841_v19  ;;  %v1645_v60 = vld [vmem:[#allocation2 + $0xf0] sm:$0xff]  ;;  %v1621_v21 = vld [vmem:[#allocation2 + $0x2d8] sm:$0xff] }
 0x1e0   : > { %1208 = vst [vmem:[#allocation2 + $0x230] sm:$0xf0] %v1192_v36  ;;  %1832 = vmatpush.msrb.mxu0 %v1682_v22  ;;  %v1683_v28 = vld [vmem:[#allocation2 + $0x1f0] sm:$0xff] }
 0x1e1   : > { %1209 = vst [vmem:[#allocation2 + $0xc0] sm:$0xf0] %v1193_v46  ;;  %1852 = vmatpush.msrb.mxu1 %v1683_v28  ;;  %v1684_v25 = vld [vmem:[#allocation2 + $0x160] sm:$0xff] }
 0x1e2   : > { %1164 = vst [vmem:[#allocation2 + $0x338] sm:$0xf] %v1148_v51  ;;  %1872 = vmatpush.msrb.mxu2 %v1684_v25 }
 0x1e3   : > { %1165 = vst [vmem:[#allocation2 + $0x230] sm:$0xf] %v1149_v30  ;;  %v1142_v52 = vpop.permute.xlu1 %1141 }
 0x1e4   : > { %1166 = vst [vmem:[#allocation2 + $0xc0] sm:$0xf] %v1150_v0  ;;  %v1151_v14 = vsel %vm1143_vm9, %v2841_v19, %v1142_v52  ;;  %v1277_v20 = vpop.permute.xlu0 %1276  ;;  %v1613_v19 = vld [vmem:[#allocation2 + $0x378] sm:$0xff] }
 0x1e5   : > { %1167 = vst [vmem:[#allocation2 + $0x128] sm:$0xf] %v1151_v14  ;;  %v1286_v35 = vsel %vm1278_vm7, %v2836_v47, %v1277_v20  ;;  %v1652_v47 = vld [vmem:[#allocation2 + $0x2a8] sm:$0xff] }
 0x1e6   : > { %1302 = vst [vmem:[#allocation2 + $0x60] sm:$0xf0] %v1286_v35 }
 0x1e7   : > { %1210 = vst [vmem:[#allocation2 + $0x128] sm:$0xf0] %v1194_v58 }
 0x1e9   : > { %v1674_v39 = vld [vmem:[#allocation2 + $0x338] sm:$0xff] }
 0x1ea   : > { %1833 = vmatpush.msrb.mxu0 %v1674_v39  ;;  %v1675_v3 = vld [vmem:[#allocation2 + $0x230] sm:$0xff] }
 0x1eb   : > { %1853 = vmatpush.msrb.mxu1 %v1675_v3  ;;  %v1676_v29 = vld [vmem:[#allocation2 + $0xc0] sm:$0xff] }
 0x1ec   : > { %1873 = vmatpush.msrb.mxu2 %v1676_v29  ;;  %1834 = vmatpush.msrb.mxu0 %v1666_v54  ;;  %v1099_v61 = vpop.permute.xlu0 %1098 }
 0x1ed   : > { %1854 = vmatpush.msrb.mxu1 %v1667_v9  ;;  %v1108_v23 = vsel %vm1100_vm14, %v2627_v63, %v1099_v61  ;;  %v1685_v24 = vld [vmem:[#allocation2 + $0x60] sm:$0xff] }
 0x1ee   : > { %1874 = vmatpush.msrb.mxu2 %v1668_v34  ;;  %1124 = vst [vmem:[#allocation2 + $0x1d8] sm:$0xf0] %v1108_v23  ;;  %1835 = vmatpush.msrb.mxu0 %v1658_v18  ;;  %v1677_v44 = vld [vmem:[#allocation2 + $0x128] sm:$0xff]  ;;  %v1644_v63 = vld [vmem:[#allocation2 + $0x320] sm:$0xff] }
 0x1ef   : > { %1855 = vmatpush.msrb.mxu1 %v1659_v1  ;;  %1892 = vmatpush.msrb.mxu3 %v1685_v24 }
 0x1f0   : > { %1875 = vmatpush.msrb.mxu2 %v1660_v62  ;;  %1836 = vmatpush.msrb.mxu0 %v1650_v45 }
 0x1f1   : > { %1856 = vmatpush.msrb.mxu1 %v1651_v13  ;;  %1893 = vmatpush.msrb.mxu3 %v1677_v44 }
 0x1f2   : > { %1876 = vmatpush.msrb.mxu2 %v1652_v47  ;;  %1837 = vmatpush.msrb.mxu0 %v1642_v11 }
 0x1f3   : > { %1857 = vmatpush.msrb.mxu1 %v1643_v43 }
 0x1f4   : > { %1877 = vmatpush.msrb.mxu2 %v1644_v63  ;;  %1838 = vmatpush.msrb.mxu0 %v1634_v57 }
 0x1f5   : > { %1858 = vmatpush.msrb.mxu1 %v1635_v41  ;;  %v1669_v5 = vld [vmem:[#allocation2 + $0x1d8] sm:$0xff] }
 0x1f6   : > { %1878 = vmatpush.msrb.mxu2 %v1636_v55  ;;  %1839 = vmatpush.msrb.mxu0 %v1626_v42 }
 0x1f7   : > { %1859 = vmatpush.msrb.mxu1 %v1627_v7  ;;  %1894 = vmatpush.msrb.mxu3 %v1669_v5 }
 0x1f8   : > { %1879 = vmatpush.msrb.mxu2 %v1628_v53  ;;  %1840 = vmatpush.msrb.mxu0 %v1618_v48 }
 0x1f9   : > { %1860 = vmatpush.msrb.mxu1 %v1619_v31  ;;  %1895 = vmatpush.msrb.mxu3 %v1661_v56 }
 0x1fa   : > { %1880 = vmatpush.msrb.mxu2 %v1620_v49  ;;  %1841 = vmatpush.msrb.mxu0 %v1610_v15 }
 0x1fb   : > { %1861 = vmatpush.msrb.mxu1 %v1611_v6  ;;  %1896 = vmatpush.msrb.mxu3 %v1653_v2 }
 0x1fc   : > { %1881 = vmatpush.msrb.mxu2 %v1612_v40  ;;  %2245 = vmatmul.msk.f32.vlgmr.msrb.gmra.mxu0 %vm666_vm4, %v4033_v17 }
 0x1fd   : > { %1897 = vmatpush.msrb.mxu3 %v1645_v60  ;;  %2249 = vmatmul.msk.f32.vlgmr.msrb.gmra.mxu2 %vm666_vm4, %v4033_v17 }
 0x1fe   : > { %2247 = vmatmul.msk.f32.vlgmr.msrb.gmra.mxu1 %vm666_vm4, %v4033_v17 }
 0x1ff   : > { %1898 = vmatpush.msrb.mxu3 %v1637_v8 }
 0x201   : > { %1899 = vmatpush.msrb.mxu3 %v1629_v33 }
 0x203   : > { %1900 = vmatpush.msrb.mxu3 %v1621_v21 }
 0x205   : > { %1901 = vmatpush.msrb.mxu3 %v1613_v19 }
 0x206   : > { %2251 = vmatmul.msk.f32.vlgmr.msrb.gmra.mxu3 %vm666_vm4, %v4033_v17 }
 0x24d   : > { %v1949_v16 = vpop.xlane.xlu1 %1948 }
 0x24e   : > { %v1950_v12 = vrot.slane %v1949_v16, 4 }
 0x250   : > { %v1951_v36 = vadd.f32 %v1950_v12, %v1949_v16 }
 0x252   : > { %v1952_v46 = vrot.slane %v1951_v36, 2 }
 0x254   : > { %v1953_v51 = vadd.f32 %v1952_v46, %v1951_v36 }
 0x256   : > { %v1954_v22 = vrot.slane %v1953_v51, 1 }
 0x258   : > { %v1955_v30 = vadd.f32 %v1954_v22, %v1953_v51  ;;  %v4072_v28 = vpop.f32.mrf.mxu0 }
 0x259   : > { %v4077_v0 = vpop.f32.mrf.mxu1  ;;  %v1957_v14 = vmul.f32 %v3966_v38, %v4072_v28 }
 0x25a   : > { %2257 = vpush %v1955_v30  ;;  %v1906_v17 = vpack.c.bf16 %v4077_v0, %v4072_v28  ;;  %v1958_v20 = vmul.f32 %v3969_v37, %v4077_v0 }
 0x25c   : > { %1910 = vst [vmem:[%s376_s10] sm:$0xff] %v1906_v17  ;;  %v1965_v58 = vadd.f32 %v1958_v20, %v1957_v14 }
 0x25d   : > { %v4081_v25 = vpop.f32.mrf.mxu2 }
 0x25e   : > { %v4083_v32 = vpop.f32.mrf.mxu3  ;;  %v1959_v35 = vmul.f32 %v3975_v4, %v4081_v25 }
 0x25f   : > { %v1907_v52 = vpack.c.bf16 %v4083_v32, %v4081_v25  ;;  %v1960_v3 = vmul.f32 %v3985_v27, %v4083_v32 }
 0x260   : > { %v1966_v39 = vadd.f32 %v1965_v58, %v1959_v35 }
 0x261   : > { %1911 = vst [vmem:[%s376_s10 + $0x8] sm:$0xff] %v1907_v52 }
 0x262   : > { %v1967_v61 = vadd.f32 %v1966_v39, %v1960_v3 }
 0x279   : > { %v4095_v29 = vpop.f32.mrf.mxu0 }
 0x27a   : > { %v1961_v34 = vmul.f32 %v3991_v10, %v4095_v29 }
 0x27b   : > { %v4097_v54 = vpop.f32.mrf.mxu1 }
 0x27c   : > { %v1908_v9 = vpack.c.bf16 %v4097_v54, %v4095_v29  ;;  %v1968_v23 = vadd.f32 %v1967_v61, %v1961_v34  ;;  %v1962_v18 = vmul.f32 %v3998_v26, %v4097_v54 }
 0x27e   : > { %1912 = vst [vmem:[%s376_s10 + $0x10] sm:$0xff] %v1908_v9  ;;  %v1969_v1 = vadd.f32 %v1968_v23, %v1962_v18 }
 0x280   : > { %v4105_v24 = vpop.f32.mrf.mxu2 }
 0x281   : > { %v1963_v62 = vmul.f32 %v4008_v59, %v4105_v24 }
 0x283   : > { %v1970_v47 = vadd.f32 %v1969_v1, %v1963_v62 }
 0x289   : > { %v4109_v45 = vpop.f32.mrf.mxu3 }
 0x28a   : > { %v1909_v13 = vpack.c.bf16 %v4109_v45, %v4105_v24  ;;  %v1964_v44 = vmul.f32 %v4016_v50, %v4109_v45 }
 0x28b   : > { %s2258_s28 = spop %2257 }
 0x28c   : > { %1913 = vst [vmem:[%s376_s10 + $0x18] sm:$0xff] %v1909_v13  ;;  %v1971_v11 = vadd.f32 %v1970_v47, %v1964_v44  ;;  %s1974_s11 = smax.f32 %s2916_s29, %s2258_s28 }
 0x28d   : > { %v1975_v43 = vstv %s1974_s11 }
 0x28e   : > { %1972 = vadd.xlane.f32.xlu2 %v1971_v11  ;;  %2848 = vrcp.f32 %v1975_v43  ;;  %v1987_v41 = vand.u32 2147483648, %v1975_v43  ;;  %vm1981_vm4 = vweird.f32 %v1975_v43  ;;  %v1985_v42 = vand.u32 2147483647, %v1975_v43 }
 0x290   : > { %v1988_v7 = vor.u32 1.1754944e-38, %v1987_v41  ;;  %vm1986_vm15 = vcmp.eq.f32.partialorder %v1985_v42, 8.507059e+37 }
 0x294   : > { %v2849_v63 = vpop.eup %2848 }
 0x295   : > { %v1977_v57 = vmul.f32 %v2849_v63, %v1975_v43  ;;  %vm1982_vm13 = vweird.f32 %v2849_v63 }
 0x296   : > { %vm1983_vm14 = vmor %vm1981_vm4, %vm1982_vm13 }
 0x297   : > { %v1978_v55 = vsub.f32 1.0, %v1977_v57 }
 0x299   : > { %v1979_v5 = vmul.f32 %v2849_v63, %v1978_v55 }
 0x29b   : > { %v1980_v53 = vadd.f32 %v2849_v63, %v1979_v5 }
 0x29d   : > { %v1984_v48 = vsel %vm1983_vm14, %v2849_v63, %v1980_v53 }
 0x29e   : > { %v1989_v31 = vsel %vm1986_vm15, %v1988_v7, %v1984_v48 }
 0x29f   : > { %2259 = vpush %v1989_v31 }
 0x2d0   : > { %s2260_s15 = spop %2259 }
 0x2d1   : > { %v1991_v56 = vstv %s2260_s15 }
 0x301   : > { %v1973_v49 = vpop.xlane.xlu2 %1972 }
 0x302   : > { %v1992_v15 = vmul.f32 %v1991_v56, %v1973_v49  ;;  %2010 = vst.msk [vmem:[%s383_s18] sm:$0xff] %vm2009_vm0, %v1973_v49 }
 0x304   : > { %v1993_v6 = vsub.f32 %v4072_v28, %v1992_v15  ;;  %v1994_v2 = vsub.f32 %v4077_v0, %v1992_v15  ;;  %v1995_v40 = vsub.f32 %v4081_v25, %v1992_v15  ;;  %v1996_v60 = vsub.f32 %v4083_v32, %v1992_v15 }
 0x305   : > { %v1997_v8 = vsub.f32 %v4095_v29, %v1992_v15  ;;  %v1998_v16 = vsub.f32 %v4097_v54, %v1992_v15  ;;  %v1999_v51 = vsub.f32 %v4105_v24, %v1992_v15  ;;  %v2000_v0 = vsub.f32 %v4109_v45, %v1992_v15 }
 0x306   : > { %v2001_v33 = vmul.f32 %v1993_v6, %v3966_v38  ;;  %v2002_v21 = vmul.f32 %v1994_v2, %v3969_v37  ;;  %v2003_v19 = vmul.f32 %v1995_v40, %v3975_v4  ;;  %v2004_v12 = vmul.f32 %v1996_v60, %v3985_v27 }
 0x307   : > { %v2005_v22 = vmul.f32 %v1997_v8, %v3991_v10  ;;  %v2006_v38 = vmul.f32 %v1998_v16, %v3998_v26  ;;  %v2007_v4 = vmul.f32 %v1999_v51, %v4008_v59  ;;  %v2008_v27 = vmul.f32 %v2000_v0, %v4016_v50 }
 0x308   : > { %v2011_v36 = vmul.f32 %v2001_v33, %v2001_v33  ;;  %v2012_v46 = vmul.f32 %v2002_v21, %v2002_v21  ;;  %v2013_v30 = vmul.f32 %v2003_v19, %v2003_v19  ;;  %v2014_v37 = vmul.f32 %v2004_v12, %v2004_v12 }
 0x309   : > { %v2015_v25 = vmul.f32 %v2005_v22, %v2005_v22  ;;  %v2016_v52 = vmul.f32 %v2006_v38, %v2006_v38  ;;  %v2017_v20 = vmul.f32 %v2007_v4, %v2007_v4  ;;  %v2018_v10 = vmul.f32 %v2008_v27, %v2008_v27 }
 0x30a   : > { %v2019_v28 = vadd.f32 %v2012_v46, %v2011_v36 }
 0x30c   : > { %v2020_v17 = vadd.f32 %v2019_v28, %v2013_v30 }
 0x30e   : > { %v2021_v32 = vadd.f32 %v2020_v17, %v2014_v37 }
 0x310   : > { %v2022_v14 = vadd.f32 %v2021_v32, %v2015_v25 }
 0x312   : > { %v2023_v58 = vadd.f32 %v2022_v14, %v2016_v52 }
 0x314   : > { %v2024_v35 = vadd.f32 %v2023_v58, %v2017_v20 }
 0x316   : > { %v2025_v39 = vadd.f32 %v2024_v35, %v2018_v10 }
 0x318   : > { %2026 = vadd.xlane.f32.xlu0 %v2025_v39 }
 0x38b   : > { %v2027_v26 = vpop.xlane.xlu0 %2026 }
 0x38c   : > { %2028 = vst.msk [vmem:[%s391_s19] sm:$0xff] %vm2009_vm0, %v2027_v26 }
 0x38d PF: > { %s17_s25 = sadd.s32 1, %s2888_s25   ;;  %s4170_s21 = smov %s2880_s23 }
 0x38e   : > { %p14_p10 = scmp.ge.s32.totalorder %s17_s25, 8   ;;  %s4171_s22 = smov %s2884_s24 }
 0x38f   : > { %s4172_s23 = smov %s4175_s26  ;;  %s4173_s24 = smov %s4179_s27 }
 0x390   :  { %16 = sbr.rel (!%p14_p10) target bundleno = 3 (0x3), region = 98 }

</bundles_post_ra>
